<compile_context>
chip_gen: v5e
topology: v5e:2x2
jax: 0.10.0
libtpu: 0.0.40
codegen_flags: <defaults>
</compile_context>

<pallas_src>
import math

import jax
import jax.numpy as jnp
from jax.experimental import pallas as pl
from jax.experimental.pallas import tpu as pltpu

H1, H2 = 400, 300            # logical hidden widths (PyTorch module)
H1_PAD, H2_PAD = 512, 384    # lane-aligned padded widths (zero padding is exact through ReLU)
DEFAULT_BATCH_TILE = 128     # rows per grid step (multiple of 8 sublanes, 128 output lanes)


def _critic_kernel(s_ref, a_ref, w1s_ref, w1a_ref, b1_ref, w2_ref, b2_ref,
                   w3_ref, b3_ref, o_ref):
    # ----- Layer 1: ReLU([s | a] @ W1 + b1) --- concat fused as two MXU dots -----
    s_bf = s_ref[...].astype(jnp.bfloat16)
    a_bf = a_ref[...].astype(jnp.bfloat16)
    h1 = jnp.dot(s_bf, w1s_ref[...], preferred_element_type=jnp.float32)
    h1 = h1 + jnp.dot(a_bf, w1a_ref[...], preferred_element_type=jnp.float32)
    h1 = jnp.maximum(h1 + b1_ref[...], 0.0)                      # f32 bias/ReLU (v5e-safe)

    # ----- Layer 2: ReLU(h1 @ W2 + b2) --- bf16 MXU inputs, f32 accumulation -----
    h2 = jnp.dot(h1.astype(jnp.bfloat16), w2_ref[...],
                 preferred_element_type=jnp.float32)
    h2 = jnp.maximum(h2 + b2_ref[...], 0.0)                      # (TB, H2_PAD) f32

    # ----- Output layer (fan-out 1): contract over features, batch lands on lanes -----
    # q[0, t] = sum_f w3[0, f] * h2[t, f]  ->  (1, TB) lane-dense row.
    q = jax.lax.dot_general(w3_ref[...], h2, (((1,), (1,)), ((), ())),
                            preferred_element_type=jnp.float32)
    o_ref[...] = (q + b3_ref[...]).astype(o_ref.dtype)


def prepare_params(params, input_dim):
    """One-time conversion of PyTorch-layout params (W:(out,in), b:(out,)) to kernel layout."""
    w1, b1, w2, b2, w3, b3 = params
    w1t = jnp.pad(w1.T, ((0, 0), (0, H1_PAD - H1)))                      # (d_in, H1_PAD)
    w1s = w1t[:input_dim].astype(jnp.bfloat16)                           # (input_dim, H1_PAD)
    w1a = w1t[input_dim:].astype(jnp.bfloat16)                           # (action_dim, H1_PAD)
    b1p = jnp.pad(b1, (0, H1_PAD - H1)).reshape(1, H1_PAD).astype(jnp.float32)
    w2t = jnp.pad(w2.T, ((0, H1_PAD - H1), (0, H2_PAD - H2))).astype(jnp.bfloat16)
    b2p = jnp.pad(b2, (0, H2_PAD - H2)).reshape(1, H2_PAD).astype(jnp.float32)
    w3r = jnp.pad(w3, ((0, 0), (0, H2_PAD - H2))).astype(jnp.float32)    # (1, H2_PAD) row
    b3p = b3.reshape(1, 1).astype(jnp.float32)
    return (w1s, w1a, b1p, w2t, b2p, w3r, b3p)


def critic_forward(s, a, kernel_params, *, batch_tile=DEFAULT_BATCH_TILE):
    """s: (B, input_dim) f32, a: (B, action_dim) f32 -> Q: (B, 1) f32."""
    w1s, w1a, b1, w2, b2, w3, b3 = kernel_params
    B = s.shape[0]
    num_tiles = pl.cdiv(B, batch_tile)
    b_pad = num_tiles * batch_tile
    if b_pad != B:                                   # pad batch up to a whole tile
        s = jnp.pad(s, ((0, b_pad - B), (0, 0)))
        a = jnp.pad(a, ((0, b_pad - B), (0, 0)))

    row = lambda i: (i, 0)                           # batch-tiled activations
    resident = lambda i: (0, 0)                      # params stay resident in VMEM

    out = pl.pallas_call(
        _critic_kernel,
        out_shape=jax.ShapeDtypeStruct((1, b_pad), jnp.float32),
        grid=(num_tiles,),
        in_specs=[
            pl.BlockSpec((batch_tile, s.shape[1]), row),
            pl.BlockSpec((batch_tile, a.shape[1]), row),
            pl.BlockSpec(w1s.shape, resident),
            pl.BlockSpec(w1a.shape, resident),
            pl.BlockSpec(b1.shape, resident),
            pl.BlockSpec(w2.shape, resident),
            pl.BlockSpec(b2.shape, resident),
            pl.BlockSpec(w3.shape, resident),
            pl.BlockSpec(b3.shape, resident),
        ],
        out_specs=pl.BlockSpec((1, batch_tile), lambda i: (0, i)),
        compiler_params=pltpu.CompilerParams(dimension_semantics=("parallel",)),
    )(s, a, w1s, w1a, b1, w2, b2, w3, b3)

    return out[0, :B].reshape(B, 1)


def init_params(key, input_dim, action_dim):
    """Deterministic synthetic init (PyTorch nn.Linear layout & uniform bounds)."""
    d_in = input_dim + action_dim
    dims = [(d_in, H1), (H1, H2), (H2, 1)]
    params = []
    for fin, fout in dims:
        kw, kb, key = jax.random.split(key, 3)
        bound = 1.0 / math.sqrt(fin)
        w = jax.random.uniform(kw, (fout, fin), jnp.float32, -bound, bound)
        b = jax.random.uniform(kb, (fout,), jnp.float32, -bound, bound)
        params.extend([w, b])
    return tuple(params)


def reference_forward(s, a, params):
    """Plain-JAX reference mirroring the kernel numerics (bf16 MXU inputs, f32 accumulate)."""
    w1, b1, w2, b2, w3, b3 = params
    x = jnp.concatenate([s, a], axis=1).astype(jnp.bfloat16)
    h1 = jnp.dot(x, w1.T.astype(jnp.bfloat16), preferred_element_type=jnp.float32) + b1
    h1 = jnp.maximum(h1, 0.0)
    h2 = jnp.dot(h1.astype(jnp.bfloat16), w2.T.astype(jnp.bfloat16),
                 preferred_element_type=jnp.float32) + b2
    h2 = jnp.maximum(h2, 0.0)
    return h2 @ w3.T + b3


if __name__ == "__main__":
    key = jax.random.PRNGKey(0)
    input_dim, action_dim, batch = 16, 8, 4

    k_s, k_a, k_p = jax.random.split(key, 3)
    s = jax.random.normal(k_s, (batch, input_dim), jnp.float32)
    a = jax.random.normal(k_a, (batch, action_dim), jnp.float32)

    params = init_params(k_p, input_dim, action_dim)      # PyTorch-layout params
    kernel_params = prepare_params(params, input_dim)     # one-time kernel layout prep

    q = critic_forward(s, a, kernel_params)
    jax.block_until_ready(q)

    q_ref = reference_forward(s, a, params)
    assert q.shape == (batch, 1)
    assert jnp.allclose(q, q_ref, atol=2e-2, rtol=2e-2), (q, q_ref)

    print("KERNEL_OK")
</pallas_src>

<mosaic_0001>
module attributes {stable_mosaic.version = 11 : i64} {
  func.func @_critic_kernel(%arg0: i32, %arg1: memref<128x16xf32, #tpu.memory_space<vmem>>, %arg2: memref<128x8xf32, #tpu.memory_space<vmem>>, %arg3: memref<16x512xbf16, #tpu.memory_space<vmem>>, %arg4: memref<8x512xbf16, #tpu.memory_space<vmem>>, %arg5: memref<1x512xf32, #tpu.memory_space<vmem>>, %arg6: memref<512x384xbf16, #tpu.memory_space<vmem>>, %arg7: memref<1x384xf32, #tpu.memory_space<vmem>>, %arg8: memref<1x384xf32, #tpu.memory_space<vmem>>, %arg9: memref<1x1xf32, #tpu.memory_space<vmem>>, %arg10: memref<1x128xf32, #tpu.memory_space<vmem>>) attributes {dimension_semantics = [#tpu.dimension_semantics<parallel>], iteration_bounds = array<i64: 1>, scalar_prefetch = 0 : i64, scratch_operands = 0 : i64, tpu.core_type = #tpu.core_type<tc>, window_params = [{transform_indices = @transform_0, window_bounds = array<i64: 128, 16>}, {transform_indices = @transform_1, window_bounds = array<i64: 128, 8>}, {pipeline_mode = #tpu.pipeline_mode<synchronous>, transform_indices = @transform_2, window_bounds = array<i64: 16, 512>}, {pipeline_mode = #tpu.pipeline_mode<synchronous>, transform_indices = @transform_3, window_bounds = array<i64: 8, 512>}, {pipeline_mode = #tpu.pipeline_mode<synchronous>, transform_indices = @transform_4, window_bounds = array<i64: 1, 512>}, {pipeline_mode = #tpu.pipeline_mode<synchronous>, transform_indices = @transform_5, window_bounds = array<i64: 512, 384>}, {pipeline_mode = #tpu.pipeline_mode<synchronous>, transform_indices = @transform_6, window_bounds = array<i64: 1, 384>}, {pipeline_mode = #tpu.pipeline_mode<synchronous>, transform_indices = @transform_7, window_bounds = array<i64: 1, 384>}, {pipeline_mode = #tpu.pipeline_mode<synchronous>, transform_indices = @transform_8, window_bounds = array<i64: 1, 1>}, {transform_indices = @transform_9, window_bounds = array<i64: 1, 128>}]} {
    %c0 = arith.constant 0 : index
    %c0_0 = arith.constant 0 : index
    %0 = vector.load %arg1[%c0, %c0_0] : memref<128x16xf32, #tpu.memory_space<vmem>>, vector<128x16xf32>
    %1 = arith.truncf %0 : vector<128x16xf32> to vector<128x16xbf16>
    %c0_1 = arith.constant 0 : index
    %c0_2 = arith.constant 0 : index
    %2 = vector.load %arg2[%c0_1, %c0_2] : memref<128x8xf32, #tpu.memory_space<vmem>>, vector<128x8xf32>
    %3 = arith.truncf %2 : vector<128x8xf32> to vector<128x8xbf16>
    %c0_3 = arith.constant 0 : index
    %c0_4 = arith.constant 0 : index
    %4 = vector.load %arg3[%c0_3, %c0_4] : memref<16x512xbf16, #tpu.memory_space<vmem>>, vector<16x512xbf16>
    %cst = arith.constant dense<0.000000e+00> : vector<128x512xf32>
    %5 = tpu.matmul %1, %4, %cst {dimension_numbers = #tpu.dot_dimension_numbers<[1], [0], [0], [1], [0, 0, 1, 1], [], []>} : vector<128x16xbf16>, vector<16x512xbf16>, vector<128x512xf32> -> vector<128x512xf32>
    %c0_5 = arith.constant 0 : index
    %c0_6 = arith.constant 0 : index
    %6 = vector.load %arg4[%c0_5, %c0_6] : memref<8x512xbf16, #tpu.memory_space<vmem>>, vector<8x512xbf16>
    %cst_7 = arith.constant dense<0.000000e+00> : vector<128x512xf32>
    %7 = tpu.matmul %3, %6, %cst_7 {dimension_numbers = #tpu.dot_dimension_numbers<[1], [0], [0], [1], [0, 0, 1, 1], [], []>} : vector<128x8xbf16>, vector<8x512xbf16>, vector<128x512xf32> -> vector<128x512xf32>
    %8 = arith.addf %5, %7 : vector<128x512xf32>
    %c0_8 = arith.constant 0 : index
    %c0_9 = arith.constant 0 : index
    %9 = vector.load %arg5[%c0_8, %c0_9] : memref<1x512xf32, #tpu.memory_space<vmem>>, vector<1x512xf32>
    %10 = vector.broadcast %9 : vector<1x512xf32> to vector<128x512xf32>
    %11 = arith.addf %8, %10 : vector<128x512xf32>
    %cst_10 = arith.constant 0.000000e+00 : f32
    %12 = vector.broadcast %cst_10 : f32 to vector<128x512xf32>
    %13 = arith.maximumf %11, %12 : vector<128x512xf32>
    %14 = arith.truncf %13 : vector<128x512xf32> to vector<128x512xbf16>
    %c0_11 = arith.constant 0 : index
    %c0_12 = arith.constant 0 : index
    %15 = vector.load %arg6[%c0_11, %c0_12] : memref<512x384xbf16, #tpu.memory_space<vmem>>, vector<512x384xbf16>
    %cst_13 = arith.constant dense<0.000000e+00> : vector<128x384xf32>
    %16 = tpu.matmul %14, %15, %cst_13 {dimension_numbers = #tpu.dot_dimension_numbers<[1], [0], [0], [1], [0, 0, 1, 1], [], []>} : vector<128x512xbf16>, vector<512x384xbf16>, vector<128x384xf32> -> vector<128x384xf32>
    %c0_14 = arith.constant 0 : index
    %c0_15 = arith.constant 0 : index
    %17 = vector.load %arg7[%c0_14, %c0_15] : memref<1x384xf32, #tpu.memory_space<vmem>>, vector<1x384xf32>
    %18 = vector.broadcast %17 : vector<1x384xf32> to vector<128x384xf32>
    %19 = arith.addf %16, %18 : vector<128x384xf32>
    %cst_16 = arith.constant 0.000000e+00 : f32
    %20 = vector.broadcast %cst_16 : f32 to vector<128x384xf32>
    %21 = arith.maximumf %19, %20 : vector<128x384xf32>
    %c0_17 = arith.constant 0 : index
    %c0_18 = arith.constant 0 : index
    %22 = vector.load %arg8[%c0_17, %c0_18] : memref<1x384xf32, #tpu.memory_space<vmem>>, vector<1x384xf32>
    %cst_19 = arith.constant dense<0.000000e+00> : vector<1x128xf32>
    %23 = tpu.matmul %22, %21, %cst_19 {dimension_numbers = #tpu.dot_dimension_numbers<[1], [1], [0], [0], [0, 0, 1, 0], [], []>} : vector<1x384xf32>, vector<128x384xf32>, vector<1x128xf32> -> vector<1x128xf32>
    %c0_20 = arith.constant 0 : index
    %c0_21 = arith.constant 0 : index
    %24 = vector.load %arg9[%c0_20, %c0_21] : memref<1x1xf32, #tpu.memory_space<vmem>>, vector<1x1xf32>
    %25 = vector.broadcast %24 : vector<1x1xf32> to vector<1x128xf32>
    %26 = arith.addf %23, %25 : vector<1x128xf32>
    %c0_22 = arith.constant 0 : index
    %c0_23 = arith.constant 0 : index
    %27 = vector.load %arg10[%c0_22, %c0_23] : memref<1x128xf32, #tpu.memory_space<vmem>>, vector<1x128xf32>
    tpu.vector_store %arg10[%c0_22, %c0_23], %26 {strides = array<i32>} : memref<1x128xf32, #tpu.memory_space<vmem>>, vector<1x128xf32>,
    return
  }
  func.func @transform_0(%arg0: i32) -> (i32, i32) {
    %c0_i32 = arith.constant 0 : i32
    %c0_i32_0 = arith.constant 0 : i32
    return %arg0, %c0_i32 : i32, i32
  }
  func.func @transform_1(%arg0: i32) -> (i32, i32) {
    %c0_i32 = arith.constant 0 : i32
    %c0_i32_0 = arith.constant 0 : i32
    return %arg0, %c0_i32 : i32, i32
  }
  func.func @transform_2(%arg0: i32) -> (i32, i32) {
    %c0_i32 = arith.constant 0 : i32
    %c0_i32_0 = arith.constant 0 : i32
    %c0_i32_1 = arith.constant 0 : i32
    return %c0_i32, %c0_i32_0 : i32, i32
  }
  func.func @transform_3(%arg0: i32) -> (i32, i32) {
    %c0_i32 = arith.constant 0 : i32
    %c0_i32_0 = arith.constant 0 : i32
    %c0_i32_1 = arith.constant 0 : i32
    return %c0_i32, %c0_i32_0 : i32, i32
  }
  func.func @transform_4(%arg0: i32) -> (i32, i32) {
    %c0_i32 = arith.constant 0 : i32
    %c0_i32_0 = arith.constant 0 : i32
    %c0_i32_1 = arith.constant 0 : i32
    return %c0_i32, %c0_i32_0 : i32, i32
  }
  func.func @transform_5(%arg0: i32) -> (i32, i32) {
    %c0_i32 = arith.constant 0 : i32
    %c0_i32_0 = arith.constant 0 : i32
    %c0_i32_1 = arith.constant 0 : i32
    return %c0_i32, %c0_i32_0 : i32, i32
  }
  func.func @transform_6(%arg0: i32) -> (i32, i32) {
    %c0_i32 = arith.constant 0 : i32
    %c0_i32_0 = arith.constant 0 : i32
    %c0_i32_1 = arith.constant 0 : i32
    return %c0_i32, %c0_i32_0 : i32, i32
  }
  func.func @transform_7(%arg0: i32) -> (i32, i32) {
    %c0_i32 = arith.constant 0 : i32
    %c0_i32_0 = arith.constant 0 : i32
    %c0_i32_1 = arith.constant 0 : i32
    return %c0_i32, %c0_i32_0 : i32, i32
  }
  func.func @transform_8(%arg0: i32) -> (i32, i32) {
    %c0_i32 = arith.constant 0 : i32
    %c0_i32_0 = arith.constant 0 : i32
    %c0_i32_1 = arith.constant 0 : i32
    return %c0_i32, %c0_i32_0 : i32, i32
  }
  func.func @transform_9(%arg0: i32) -> (i32, i32) {
    %c0_i32 = arith.constant 0 : i32
    %c0_i32_0 = arith.constant 0 : i32
    return %c0_i32, %arg0 : i32, i32
  }
}

</mosaic_0001>

<bundles_post_ra>
// kernel: tpu_custom_call.1
= control target key start
LH: loop header
LB: loop body
LE: loop exit
PB: predicated region body
PF: predicated region fallthrough
CT: control target
= control target key end

     0   :  { %s3647_s0 = inlined_call_operand.vmem [shape: f32[128,16], index: 0, kind: input, shape index: {}]   ;;  %s3648_s1 = inlined_call_operand.vmem [shape: f32[128,8], index: 1, kind: input, shape index: {}]   ;;  %s3649_s2 = inlined_call_operand.vmem [shape: bf16[16,512], index: 2, kind: input, shape index: {}]   ;;  %s3650_s3 = inlined_call_operand.vmem [shape: bf16[8,512], index: 3, kind: input, shape index: {}]   ;;  %s3651_s4 = inlined_call_operand.vmem [shape: f32[1,512], index: 4, kind: input, shape index: {}]   ;;  %s3652_s5 = inlined_call_operand.hbm [shape: bf16[512,384], index: 5, kind: input, shape index: {}]   ;;  %s3653_s6 = inlined_call_operand.vmem [shape: f32[1,384], index: 6, kind: input, shape index: {}]   ;;  %s3654_s7 = inlined_call_operand.vmem [shape: f32[1,384], index: 7, kind: input, shape index: {}]   ;;  %s3655_s8 = inlined_call_operand.<no memory space> [shape: f32[1,1], index: 8, kind: input, shape index: {}]   ;;  %s3656_s9 = inlined_call_operand.hbm [shape: f32[1,128], index: 9, kind: output, shape index: {}]  }
   0x1   :  { %v14_v0 = vstv %s3655_s8 }
   0x2   :  { %15 = vst [vmem:[#allocation2] sm:$0x1] %v14_v0 }
   0x3   :  { %16 = vsyncpa [#allocation4], 0 }
   0x4   :  { %17 = vsyncpa [#allocation5], 0  ;;  %s32_s13 = sshll.u32 %s3652_s5, 4  ;;  %s2760_s14 = smov [#allocation3]   ;;  %s33_s13 = int_to_ptr.hbm [resolvable:$true] %s32_s13 }
   0x5   :  { %s34_s15 = sshll.u32 %s2760_s14, 4  ;;  %s2761_s16 = smov 192   ;;  %s35_s15 = int_to_ptr.vmem [resolvable:$true] %s34_s15 }
   0x6   :  { %s2762_s17 = smov 12  }
   0x7   :  { %40 = dma.hbm_to_vmem [thread:$0]  %s33_s13, 12288, %s35_s15, [#allocation4], %s2761_s16, %s2761_s16, %s2762_s17  }
   0x8   :  { %2756 = dma.done.wait [#allocation4], 12288  }
   0x9   :  { %2757 = vsyncadd [#allocation4], 4294955008  ;;  %v104_v1 = vld [vmem:[%s3650_s3] sm:$0xff]  ;;  %v105_v2 = vld [vmem:[%s3650_s3 + $0x8] sm:$0xff]  ;;  %vm141_vm0 = vcmask 1043456   ;;  %vm116_vm1 = vcmask 64512  }
   0xa   :  { %v108_v3 = vunpack.c.l.b16 %v104_v1  ;;  %v109_v4 = vunpack.c.h.b16 %v104_v1  ;;  %v110_v5 = vunpack.c.l.b16 %v105_v2  ;;  %v111_v6 = vunpack.c.h.b16 %v105_v2  ;;  %v76_v7 = vld [vmem:[%s3648_s1] sm:$0xff]  ;;  %v77_v8 = vld [vmem:[%s3648_s1 + $0x8] sm:$0xff]  ;;  %v78_v18 = vld [vmem:[%s3648_s1 + $0x10] sm:$0xff]  ;;  %s2128_s28 = sshll.u32 %s3656_s9, 4  ;;  %s2129_s28 = int_to_ptr.hbm [resolvable:$true] %s2128_s28 }
   0xb   :  { %v92_v13 = vpack.c.bf16 %v77_v8, %v76_v7  ;;  %v79_v19 = vld [vmem:[%s3648_s1 + $0x18] sm:$0xff]  ;;  %v80_v21 = vld [vmem:[%s3648_s1 + $0x20] sm:$0xff]  ;;  %v81_v22 = vld [vmem:[%s3648_s1 + $0x28] sm:$0xff]  ;;  %vm370_vm2 = vcmask 130048  }
   0xc   :  { %v112_v9 = vpack.c.b16 %v108_v3, %v108_v3  ;;  %v113_v10 = vpack.c.b16 %v109_v4, %v109_v4  ;;  %v114_v11 = vpack.c.b16 %v110_v5, %v110_v5  ;;  %v115_v12 = vpack.c.b16 %v111_v6, %v111_v6  ;;  %v2180_v24 = vld [vmem:[%s3649_s2 + $0x8] sm:$0xf]  ;;  %v2605_v25 = vld [vmem:[%s3649_s2 + $0x14] sm:$0xf0]  ;;  %v2603_v26 = vld [vmem:[%s3649_s2 + $0xc] sm:$0xf] }
   0xd   :  { %v93_v20 = vpack.c.bf16 %v79_v19, %v78_v18  ;;  %v94_v23 = vpack.c.bf16 %v81_v22, %v80_v21  ;;  %v2181_v27 = vor.u32 %v2605_v25, %v2180_v24  ;;  %v2182_v28 = vld [vmem:[%s3649_s2 + $0x18] sm:$0xf0]  ;;  %v2172_v29 = vld [vmem:[%s3649_s2] sm:$0xf]  ;;  %v2604_v30 = vld [vmem:[%s3649_s2 + $0xc] sm:$0xf0] }
   0xe   :  { %v143_v14 = vsel %vm141_vm0, %v112_v9, 0  ;;  %v146_v15 = vsel %vm141_vm0, %v113_v10, 0  ;;  %v149_v16 = vsel %vm141_vm0, %v114_v11, 0  ;;  %v152_v17 = vsel %vm141_vm0, %v115_v12, 0  ;;  %v2602_v33 = vld [vmem:[%s3649_s2 + $0x4] sm:$0xf] }
   0xf   :  { %161 = vmatpush.bf16.msra.mxu0 %v143_v14  ;;  %210 = vmatpush.bf16.msra.mxu1 %v146_v15  ;;  %v2185_v31 = vor.u32 %v2603_v26, %v2182_v28  ;;  %v2173_v32 = vor.u32 %v2604_v30, %v2172_v29  ;;  %v2174_v34 = vld [vmem:[%s3649_s2 + $0x10] sm:$0xf0]  ;;  %v83_v37 = vld [vmem:[%s3648_s1 + $0x38] sm:$0xff]  ;;  %v84_v39 = vld [vmem:[%s3648_s1 + $0x40] sm:$0xff] }
  0x10   :  { %259 = vmatpush.bf16.msra.mxu2 %v149_v16  ;;  %308 = vmatpush.bf16.msra.mxu3 %v152_v17  ;;  %v2177_v35 = vor.u32 %v2602_v33, %v2174_v34  ;;  %v82_v36 = vld [vmem:[%s3648_s1 + $0x30] sm:$0xff]  ;;  %v85_v40 = vld [vmem:[%s3648_s1 + $0x48] sm:$0xff]  ;;  %v87_v43 = vld [vmem:[%s3648_s1 + $0x58] sm:$0xff] }
  0x11   :  { %v95_v38 = vpack.c.bf16 %v83_v37, %v82_v36  ;;  %v96_v41 = vpack.c.bf16 %v85_v40, %v84_v39  ;;  %v86_v42 = vld [vmem:[%s3648_s1 + $0x50] sm:$0xff]  ;;  %v88_v45 = vld [vmem:[%s3648_s1 + $0x60] sm:$0xff]  ;;  %v89_v46 = vld [vmem:[%s3648_s1 + $0x68] sm:$0xff] }
  0x12   :  { %2138 = vmatmul.msk.bf16.vlgmr.msra.gmra.mxu0 %vm116_vm1, %v92_v13  ;;  %2146 = vmatmul.msk.bf16.vlgmr.msra.gmra.mxu1 %vm116_vm1, %v92_v13  ;;  %v97_v44 = vpack.c.bf16 %v87_v43, %v86_v42  ;;  %v98_v47 = vpack.c.bf16 %v89_v46, %v88_v45  ;;  %v90_v48 = vld [vmem:[%s3648_s1 + $0x70] sm:$0xff]  ;;  %v91_v49 = vld [vmem:[%s3648_s1 + $0x78] sm:$0xff]  ;;  %v52_v51 = vld [vmem:[%s3647_s0] sm:$0xff] }
  0x13   :  { %2154 = vmatmul.msk.bf16.vlgmr.msra.gmra.mxu2 %vm116_vm1, %v92_v13  ;;  %2162 = vmatmul.msk.bf16.vlgmr.msra.gmra.mxu3 %vm116_vm1, %v92_v13  ;;  %v99_v50 = vpack.c.bf16 %v91_v49, %v90_v48  ;;  %v53_v52 = vld [vmem:[%s3647_s0 + $0x8] sm:$0xff]  ;;  %v54_v60 = vld [vmem:[%s3647_s0 + $0x10] sm:$0xff]  ;;  %v55_v61 = vld [vmem:[%s3647_s0 + $0x18] sm:$0xff] }
  0x14   :  { %500 = vmatpush.bf16.msrb.mxu2 %v2181_v27  ;;  %549 = vmatpush.bf16.msrb.mxu3 %v2185_v31  ;;  %v68_v53 = vpack.c.bf16 %v53_v52, %v52_v51  ;;  %v69_v0 = vpack.c.bf16 %v55_v61, %v54_v60  ;;  %v56_v7 = vld [vmem:[%s3647_s0 + $0x20] sm:$0xff]  ;;  %v57_v8 = vld [vmem:[%s3647_s0 + $0x28] sm:$0xff]  ;;  %v58_v18 = vld [vmem:[%s3647_s0 + $0x30] sm:$0xff] }
  0x15   :  { %402 = vmatpush.bf16.msrb.mxu0 %v2173_v32  ;;  %451 = vmatpush.bf16.msrb.mxu1 %v2177_v35  ;;  %v70_v11 = vpack.c.bf16 %v57_v8, %v56_v7  ;;  %v59_v19 = vld [vmem:[%s3647_s0 + $0x38] sm:$0xff]  ;;  %v2496_v29 = vld [vmem:[#allocation3 + $0x228] sm:$0xf]  ;;  %v2484_v52 = vld [vmem:[#allocation3 + $0x210] sm:$0xf] }
  0x16   :  { %v71_v22 = vpack.c.bf16 %v59_v19, %v58_v18  ;;  %v2676_v30 = vld [vmem:[#allocation3 + $0x230] sm:$0xf0]  ;;  %v2304_v31 = vld [vmem:[#allocation3 + $0xa8] sm:$0xf]  ;;  %v2292_v60 = vld [vmem:[#allocation3 + $0x90] sm:$0xf] }
  0x17   :  { %v2497_v32 = vor.u32 %v2676_v30, %v2496_v29  ;;  %v2628_v33 = vld [vmem:[#allocation3 + $0xb0] sm:$0xf0]  ;;  %v2592_v34 = vld [vmem:[#allocation3 + $0x2e8] sm:$0xf]  ;;  %v2580_v7 = vld [vmem:[#allocation3 + $0x2d0] sm:$0xf] }
  0x18   :  { %v2700_v35 = vld [vmem:[#allocation3 + $0x2f0] sm:$0xf0]  ;;  %v2305_v36 = vor.u32 %v2628_v33, %v2304_v31  ;;  %v61_v42 = vld [vmem:[%s3647_s0 + $0x48] sm:$0xff]  ;;  %v2697_v8 = vld [vmem:[#allocation3 + $0x2d8] sm:$0xf0] }
  0x19   :  { %v2593_v37 = vor.u32 %v2700_v35, %v2592_v34  ;;  %v2652_v39 = vld [vmem:[#allocation3 + $0x170] sm:$0xf0]  ;;  %1507 = vmatpush.bf16.msra.mxu2 %v2497_v32  ;;  %v2581_v18 = vor.u32 %v2697_v8, %v2580_v7  ;;  %v2388_v19 = vld [vmem:[#allocation3 + $0x150] sm:$0xf]  ;;  %v2568_v8 = vld [vmem:[#allocation3 + $0x2b8] sm:$0xf] }
  0x1a   :  { %1409 = vmatpush.bf16.msra.mxu0 %v2305_v36  ;;  %v62_v30 = vld [vmem:[%s3647_s0 + $0x50] sm:$0xff]  ;;  %v63_v31 = vld [vmem:[%s3647_s0 + $0x58] sm:$0xff] }
  0x1b   :  { %1556 = vmatpush.bf16.msra.mxu3 %v2593_v37  ;;  %v73_v34 = vpack.c.bf16 %v63_v31, %v62_v30  ;;  %v2619_v30 = vld [vmem:[#allocation3 + $0x68] sm:$0xf0]  ;;  %v2364_v31 = vld [vmem:[#allocation3 + $0x120] sm:$0xf] }
  0x1f   :  { %1557 = vmatpush.bf16.msra.mxu3 %v2581_v18  ;;  %v64_v18 = vld [vmem:[%s3647_s0 + $0x60] sm:$0xff] }
  0x22   :  { %2139 = vmatmul.msk.bf16.gmra.mxu0 %vm116_vm1, %v93_v20  ;;  %2147 = vmatmul.msk.bf16.gmra.mxu1 %vm116_vm1, %v93_v20 }
  0x23   :  { %2155 = vmatmul.msk.bf16.gmra.mxu2 %vm116_vm1, %v93_v20  ;;  %2163 = vmatmul.msk.bf16.gmra.mxu3 %vm116_vm1, %v93_v20 }
  0x32   :  { %2140 = vmatmul.msk.bf16.gmra.mxu0 %vm116_vm1, %v94_v23  ;;  %2148 = vmatmul.msk.bf16.gmra.mxu1 %vm116_vm1, %v94_v23 }
  0x33   :  { %2156 = vmatmul.msk.bf16.gmra.mxu2 %vm116_vm1, %v94_v23  ;;  %2164 = vmatmul.msk.bf16.gmra.mxu3 %vm116_vm1, %v94_v23 }
  0x42   :  { %2141 = vmatmul.msk.bf16.gmra.mxu0 %vm116_vm1, %v95_v38  ;;  %2149 = vmatmul.msk.bf16.gmra.mxu1 %vm116_vm1, %v95_v38 }
  0x43   :  { %2157 = vmatmul.msk.bf16.gmra.mxu2 %vm116_vm1, %v95_v38  ;;  %2165 = vmatmul.msk.bf16.gmra.mxu3 %vm116_vm1, %v95_v38  ;;  %v2400_v38 = vld [vmem:[#allocation3 + $0x168] sm:$0xf] }
  0x44   :  { %v2401_v40 = vor.u32 %v2652_v39, %v2400_v38 }
  0x46   :  { %1458 = vmatpush.bf16.msra.mxu1 %v2401_v40 }
  0x52   :  { %2142 = vmatmul.msk.bf16.gmra.mxu0 %vm116_vm1, %v96_v41  ;;  %2150 = vmatmul.msk.bf16.gmra.mxu1 %vm116_vm1, %v96_v41 }
  0x53   :  { %2158 = vmatmul.msk.bf16.gmra.mxu2 %vm116_vm1, %v96_v41  ;;  %2166 = vmatmul.msk.bf16.gmra.mxu3 %vm116_vm1, %v96_v41  ;;  %v60_v41 = vld [vmem:[%s3647_s0 + $0x40] sm:$0xff] }
  0x54   :  { %v72_v45 = vpack.c.bf16 %v61_v42, %v60_v41  ;;  %v2472_v41 = vld [vmem:[#allocation3 + $0x1f8] sm:$0xf]  ;;  %v2670_v42 = vld [vmem:[#allocation3 + $0x200] sm:$0xf0] }
  0x62   :  { %2143 = vmatmul.msk.bf16.gmra.mxu0 %vm116_vm1, %v97_v44  ;;  %2151 = vmatmul.msk.bf16.gmra.mxu1 %vm116_vm1, %v97_v44 }
  0x63   :  { %2159 = vmatmul.msk.bf16.gmra.mxu2 %vm116_vm1, %v97_v44  ;;  %2167 = vmatmul.msk.bf16.gmra.mxu3 %vm116_vm1, %v97_v44 }
  0x72   :  { %2144 = vmatmul.msk.bf16.gmra.mxu0 %vm116_vm1, %v98_v47  ;;  %2152 = vmatmul.msk.bf16.gmra.mxu1 %vm116_vm1, %v98_v47 }
  0x73   :  { %2160 = vmatmul.msk.bf16.gmra.mxu2 %vm116_vm1, %v98_v47  ;;  %2168 = vmatmul.msk.bf16.gmra.mxu3 %vm116_vm1, %v98_v47 }
  0x82   :  { %2145 = vmatmul.msk.bf16.gmra.mxu0 %vm116_vm1, %v99_v50  ;;  %2153 = vmatmul.msk.bf16.gmra.mxu1 %vm116_vm1, %v99_v50 }
  0x83   :  { %2161 = vmatmul.msk.bf16.gmra.mxu2 %vm116_vm1, %v99_v50  ;;  %2169 = vmatmul.msk.bf16.gmra.mxu3 %vm116_vm1, %v99_v50 }
  0x8f   :  { %v2937_v54 = vpop.f32.mrf.mxu0  ;;  %v2939_v55 = vpop.f32.mrf.mxu1 }
  0x92   :  { %2186 = vmatmul.msk.bf16.vlgmr.msrb.gmra.mxu0 %vm370_vm2, %v68_v53  ;;  %2194 = vmatmul.msk.bf16.vlgmr.msrb.gmra.mxu1 %vm370_vm2, %v68_v53 }
  0x93   :  { %2202 = vmatmul.msk.bf16.vlgmr.msrb.gmra.mxu2 %vm370_vm2, %v68_v53  ;;  %2210 = vmatmul.msk.bf16.vlgmr.msrb.gmra.mxu3 %vm370_vm2, %v68_v53  ;;  %v2673_v53 = vld [vmem:[#allocation3 + $0x218] sm:$0xf0] }
  0x94   :  { %v2485_v61 = vor.u32 %v2673_v53, %v2484_v52  ;;  %v2473_v52 = vor.u32 %v2670_v42, %v2472_v41  ;;  %v2622_v53 = vld [vmem:[#allocation3 + $0x80] sm:$0xf0]  ;;  %v2643_v41 = vld [vmem:[#allocation3 + $0x128] sm:$0xf0] }
  0x95   :  { %v2365_v42 = vor.u32 %v2643_v41, %v2364_v31  ;;  %v2244_v41 = vld [vmem:[#allocation3 + $0x30] sm:$0xf] }
  0x96   :  { %v2945_v56 = vpop.f32.mrf.mxu2  ;;  %v2947_v57 = vpop.f32.mrf.mxu3  ;;  %1508 = vmatpush.bf16.msra.mxu2 %v2485_v61  ;;  %v2646_v61 = vld [vmem:[#allocation3 + $0x140] sm:$0xf0] }
  0x97   :  { %v2949_v58 = vpop.f32.mrf.mxu0  ;;  %v2951_v59 = vpop.f32.mrf.mxu1 }
  0x9a   :  { %1509 = vmatpush.bf16.msra.mxu2 %v2473_v52  ;;  %v2256_v52 = vld [vmem:[#allocation3 + $0x48] sm:$0xf] }
  0x9e   :  { %v2959_v62 = vpop.f32.mrf.mxu2  ;;  %v2961_v63 = vpop.f32.mrf.mxu3 }
  0x9f   :  { %v2963_v1 = vpop.f32.mrf.mxu0  ;;  %v2965_v2 = vpop.f32.mrf.mxu1 }
  0xa2   :  { %2187 = vmatmul.msk.bf16.gmra.mxu0 %vm370_vm2, %v69_v0  ;;  %2195 = vmatmul.msk.bf16.gmra.mxu1 %vm370_vm2, %v69_v0 }
  0xa3   :  { %2203 = vmatmul.msk.bf16.gmra.mxu2 %vm370_vm2, %v69_v0  ;;  %2211 = vmatmul.msk.bf16.gmra.mxu3 %vm370_vm2, %v69_v0  ;;  %v2625_v0 = vld [vmem:[#allocation3 + $0x98] sm:$0xf0] }
  0xa6   :  { %v2971_v3 = vpop.f32.mrf.mxu2  ;;  %v2973_v4 = vpop.f32.mrf.mxu3 }
  0xa7   :  { %v2975_v5 = vpop.f32.mrf.mxu0  ;;  %v2977_v6 = vpop.f32.mrf.mxu1 }
  0xae   :  { %v2985_v9 = vpop.f32.mrf.mxu2  ;;  %v2987_v10 = vpop.f32.mrf.mxu3 }
  0xaf   :  { %v2989_v12 = vpop.f32.mrf.mxu0  ;;  %v2991_v13 = vpop.f32.mrf.mxu1 }
  0xb2   :  { %2188 = vmatmul.msk.bf16.gmra.mxu0 %vm370_vm2, %v70_v11  ;;  %2196 = vmatmul.msk.bf16.gmra.mxu1 %vm370_vm2, %v70_v11 }
  0xb3   :  { %2204 = vmatmul.msk.bf16.gmra.mxu2 %vm370_vm2, %v70_v11  ;;  %2212 = vmatmul.msk.bf16.gmra.mxu3 %vm370_vm2, %v70_v11  ;;  %v2293_v11 = vor.u32 %v2625_v0, %v2292_v60  ;;  %v2376_v60 = vld [vmem:[#allocation3 + $0x138] sm:$0xf] }
  0xb4   :  { %v2377_v7 = vor.u32 %v2646_v61, %v2376_v60 }
  0xb5   :  { %1410 = vmatpush.bf16.msra.mxu0 %v2293_v11  ;;  %v2694_v11 = vld [vmem:[#allocation3 + $0x2c0] sm:$0xf0] }
  0xb6   :  { %v2997_v14 = vpop.f32.mrf.mxu2  ;;  %v2999_v15 = vpop.f32.mrf.mxu3 }
  0xb7   :  { %v3001_v16 = vpop.f32.mrf.mxu0  ;;  %v3003_v17 = vpop.f32.mrf.mxu1 }
  0xbe   :  { %v3011_v20 = vpop.f32.mrf.mxu2  ;;  %v3013_v21 = vpop.f32.mrf.mxu3 }
  0xbf   :  { %v3015_v23 = vpop.f32.mrf.mxu0  ;;  %v3017_v24 = vpop.f32.mrf.mxu1 }
  0xc2   :  { %2189 = vmatmul.msk.bf16.gmra.mxu0 %vm370_vm2, %v71_v22  ;;  %2197 = vmatmul.msk.bf16.gmra.mxu1 %vm370_vm2, %v71_v22 }
  0xc3   :  { %2205 = vmatmul.msk.bf16.gmra.mxu2 %vm370_vm2, %v71_v22  ;;  %2213 = vmatmul.msk.bf16.gmra.mxu3 %vm370_vm2, %v71_v22  ;;  %v2649_v22 = vld [vmem:[#allocation3 + $0x158] sm:$0xf0] }
  0xc4   :  { %v2389_v29 = vor.u32 %v2649_v22, %v2388_v19  ;;  %v65_v19 = vld [vmem:[%s3647_s0 + $0x68] sm:$0xff]  ;;  %v2569_v22 = vor.u32 %v2694_v11, %v2568_v8  ;;  %v2640_v11 = vld [vmem:[#allocation3 + $0x110] sm:$0xf0] }
  0xc5   :  { %v74_v60 = vpack.c.bf16 %v65_v19, %v64_v18  ;;  %v2556_v18 = vld [vmem:[#allocation3 + $0x2a0] sm:$0xf]  ;;  %v2691_v19 = vld [vmem:[#allocation3 + $0x2a8] sm:$0xf0] }
  0xc6   :  { %v3023_v25 = vpop.f32.mrf.mxu2  ;;  %v3025_v26 = vpop.f32.mrf.mxu3  ;;  %1459 = vmatpush.bf16.msra.mxu1 %v2389_v29  ;;  %v2268_v29 = vld [vmem:[#allocation3 + $0x60] sm:$0xf]  ;;  %1558 = vmatpush.bf16.msra.mxu3 %v2569_v22 }
  0xc7   :  { %v3027_v27 = vpop.f32.mrf.mxu0  ;;  %v3029_v28 = vpop.f32.mrf.mxu1 }
  0xca   :  { %1460 = vmatpush.bf16.msra.mxu1 %v2377_v7  ;;  %v2352_v7 = vld [vmem:[#allocation3 + $0x108] sm:$0xf] }
  0xcb   :  { %v2353_v22 = vor.u32 %v2640_v11, %v2352_v7  ;;  %v2448_v11 = vld [vmem:[#allocation3 + $0x1c8] sm:$0xf] }
  0xce   :  { %v3037_v43 = vpop.f32.mrf.mxu2  ;;  %v3039_v44 = vpop.f32.mrf.mxu3  ;;  %1461 = vmatpush.bf16.msra.mxu1 %v2365_v42  ;;  %v2613_v42 = vld [vmem:[#allocation3 + $0x38] sm:$0xf0] }
  0xcf   :  { %v3041_v46 = vpop.f32.mrf.mxu0  ;;  %v3043_v47 = vpop.f32.mrf.mxu1 }
  0xd2   :  { %2190 = vmatmul.msk.bf16.gmra.mxu0 %vm370_vm2, %v72_v45  ;;  %2198 = vmatmul.msk.bf16.gmra.mxu1 %vm370_vm2, %v72_v45 }
  0xd3   :  { %2206 = vmatmul.msk.bf16.gmra.mxu2 %vm370_vm2, %v72_v45  ;;  %2214 = vmatmul.msk.bf16.gmra.mxu3 %vm370_vm2, %v72_v45  ;;  %v2280_v45 = vld [vmem:[#allocation3 + $0x78] sm:$0xf] }
  0xd4   :  { %v2281_v0 = vor.u32 %v2622_v53, %v2280_v45  ;;  %1462 = vmatpush.bf16.msra.mxu1 %v2353_v22  ;;  %v2232_v22 = vld [vmem:[#allocation3 + $0x18] sm:$0xf] }
  0xd6   :  { %v3049_v48 = vpop.f32.mrf.mxu2  ;;  %v3051_v49 = vpop.f32.mrf.mxu3  ;;  %1411 = vmatpush.bf16.msra.mxu0 %v2281_v0  ;;  %v2616_v0 = vld [vmem:[#allocation3 + $0x50] sm:$0xf0] }
  0xd7   :  { %v3053_v50 = vpop.f32.mrf.mxu0  ;;  %v3055_v51 = vpop.f32.mrf.mxu1  ;;  %v2257_v8 = vor.u32 %v2616_v0, %v2256_v52  ;;  %v2245_v52 = vor.u32 %v2613_v42, %v2244_v41  ;;  %v2637_v0 = vld [vmem:[#allocation3 + $0xf8] sm:$0xf0]  ;;  %v2610_v41 = vld [vmem:[#allocation3 + $0x20] sm:$0xf0] }
  0xde   :  { %v3063_v32 = vpop.f32.mrf.mxu2  ;;  %v3065_v33 = vpop.f32.mrf.mxu3 }
  0xdf   :  { %v3067_v35 = vpop.f32.mrf.mxu0  ;;  %v3069_v36 = vpop.f32.mrf.mxu1 }
  0xe2   :  { %2191 = vmatmul.msk.bf16.gmra.mxu0 %vm370_vm2, %v73_v34  ;;  %2199 = vmatmul.msk.bf16.gmra.mxu1 %vm370_vm2, %v73_v34 }
  0xe3   :  { %2207 = vmatmul.msk.bf16.gmra.mxu2 %vm370_vm2, %v73_v34  ;;  %2215 = vmatmul.msk.bf16.gmra.mxu3 %vm370_vm2, %v73_v34  ;;  %v2269_v34 = vor.u32 %v2619_v30, %v2268_v29  ;;  %v2460_v29 = vld [vmem:[#allocation3 + $0x1e0] sm:$0xf]  ;;  %v2667_v30 = vld [vmem:[#allocation3 + $0x1e8] sm:$0xf0] }
  0xe4   :  { %v2461_v31 = vor.u32 %v2667_v30, %v2460_v29  ;;  %v2544_v29 = vld [vmem:[#allocation3 + $0x288] sm:$0xf] }
  0xe5   :  { %1412 = vmatpush.bf16.msra.mxu0 %v2269_v34  ;;  %v2557_v34 = vor.u32 %v2691_v19, %v2556_v18 }
  0xe6   :  { %v3075_v37 = vpop.f32.mrf.mxu2  ;;  %v3077_v38 = vpop.f32.mrf.mxu3  ;;  %1510 = vmatpush.bf16.msra.mxu2 %v2461_v31  ;;  %v2233_v31 = vor.u32 %v2610_v41, %v2232_v22  ;;  %v2607_v22 = vld [vmem:[#allocation3 + $0x8] sm:$0xf0]  ;;  %v2316_v41 = vld [vmem:[#allocation3 + $0xc0] sm:$0xf] }
  0xe7   :  { %3674 = vst [vmem:[#allocation9_spill] sm:$0xff] %v3075_v37  ;;  %v3079_v39 = vpop.f32.mrf.mxu0  ;;  %v3081_v40 = vpop.f32.mrf.mxu1  ;;  %1559 = vmatpush.bf16.msra.mxu3 %v2557_v34  ;;  %v2634_v34 = vld [vmem:[#allocation3 + $0xe0] sm:$0xf0] }
  0xe8   :  { %3675 = vst [vmem:[#allocation10_spill] sm:$0xff] %v3077_v38 }
  0xe9   :  { %3676 = vst [vmem:[#allocation11_spill] sm:$0xff] %v3079_v39  ;;  %1413 = vmatpush.bf16.msra.mxu0 %v2257_v8 }
  0xea   :  { %3677 = vst [vmem:[#allocation12_spill] sm:$0xff] %v3081_v40 }
  0xed   :  { %1414 = vmatpush.bf16.msra.mxu0 %v2245_v52  ;;  %v2685_v52 = vld [vmem:[#allocation3 + $0x278] sm:$0xf0] }
  0xee   :  { %v3089_v45 = vpop.f32.mrf.mxu2  ;;  %v3091_v53 = vpop.f32.mrf.mxu3 }
  0xef   :  { %3678 = vst [vmem:[#allocation13_spill] sm:$0xff] %v3089_v45  ;;  %v3093_v61 = vpop.f32.mrf.mxu0  ;;  %v3095_v38 = vpop.f32.mrf.mxu1 }
  0xf0   :  { %3679 = vst [vmem:[#allocation14_spill] sm:$0xff] %v3091_v53 }
  0xf1   :  { %3680 = vst [vmem:[#allocation15_spill] sm:$0xff] %v3093_v61  ;;  %v2664_v61 = vld [vmem:[#allocation3 + $0x1d0] sm:$0xf0]  ;;  %1415 = vmatpush.bf16.msra.mxu0 %v2233_v31 }
  0xf2   :  { %3681 = vst [vmem:[#allocation16_spill] sm:$0xff] %v3095_v38  ;;  %2192 = vmatmul.msk.bf16.gmra.mxu0 %vm370_vm2, %v74_v60  ;;  %2200 = vmatmul.msk.bf16.gmra.mxu1 %vm370_vm2, %v74_v60  ;;  %v2340_v38 = vld [vmem:[#allocation3 + $0xf0] sm:$0xf]  ;;  %v2449_v45 = vor.u32 %v2664_v61, %v2448_v11  ;;  %v67_v11 = vld [vmem:[%s3647_s0 + $0x78] sm:$0xff] }
  0xf3   :  { %2208 = vmatmul.msk.bf16.gmra.mxu2 %vm370_vm2, %v74_v60  ;;  %2216 = vmatmul.msk.bf16.gmra.mxu3 %vm370_vm2, %v74_v60  ;;  %v2341_v7 = vor.u32 %v2637_v0, %v2340_v38  ;;  %v2688_v60 = vld [vmem:[#allocation3 + $0x290] sm:$0xf0]  ;;  %v2328_v38 = vld [vmem:[#allocation3 + $0xd8] sm:$0xf]  ;;  %v2436_v0 = vld [vmem:[#allocation3 + $0x1b0] sm:$0xf] }
  0xf4   :  { %v2545_v8 = vor.u32 %v2688_v60, %v2544_v29  ;;  %1511 = vmatpush.bf16.msra.mxu2 %v2449_v45  ;;  %v2329_v42 = vor.u32 %v2634_v34, %v2328_v38  ;;  %v66_v61 = vld [vmem:[%s3647_s0 + $0x70] sm:$0xff]  ;;  %v2220_v60 = vld [vmem:[#allocation3] sm:$0xf]  ;;  %v2424_v34 = vld [vmem:[#allocation3 + $0x198] sm:$0xf] }
  0xf5   :  { %1463 = vmatpush.bf16.msra.mxu1 %v2341_v7  ;;  %v2221_v45 = vor.u32 %v2607_v22, %v2220_v60 }
  0xf6   :  { %v3101_v30 = vpop.f32.mrf.mxu2  ;;  %v3103_v53 = vpop.f32.mrf.mxu3  ;;  %1560 = vmatpush.bf16.msra.mxu3 %v2545_v8  ;;  %v2631_v8 = vld [vmem:[#allocation3 + $0xc8] sm:$0xf0] }
  0xf7   :  { %3682 = vst [vmem:[#allocation17_spill] sm:$0xff] %v3101_v30  ;;  %v3105_v18 = vpop.f32.mrf.mxu0  ;;  %v3107_v19 = vpop.f32.mrf.mxu1  ;;  %v2661_v30 = vld [vmem:[#allocation3 + $0x1b8] sm:$0xf0]  ;;  %v2317_v38 = vor.u32 %v2631_v8, %v2316_v41  ;;  %1416 = vmatpush.bf16.msra.mxu0 %v2221_v45 }
  0xf8   :  { %3683 = vst [vmem:[#allocation18_spill] sm:$0xff] %v3103_v53  ;;  %v2532_v53 = vld [vmem:[#allocation3 + $0x270] sm:$0xf]  ;;  %v2437_v29 = vor.u32 %v2661_v30, %v2436_v0  ;;  %v75_v30 = vpack.c.bf16 %v67_v11, %v66_v61  ;;  %v2679_v61 = vld [vmem:[#allocation3 + $0x248] sm:$0xf0] }
  0xf9   :  { %3684 = vst [vmem:[#allocation19_spill] sm:$0xff] %v3105_v18  ;;  %v2533_v7 = vor.u32 %v2685_v52, %v2532_v53  ;;  %1464 = vmatpush.bf16.msra.mxu1 %v2329_v42  ;;  %v2520_v18 = vld [vmem:[#allocation3 + $0x258] sm:$0xf]  ;;  %v2682_v53 = vld [vmem:[#allocation3 + $0x260] sm:$0xf0] }
  0xfa   :  { %3685 = vst [vmem:[#allocation20_spill] sm:$0xff] %v3107_v19  ;;  %1512 = vmatpush.bf16.msra.mxu2 %v2437_v29  ;;  %v2658_v19 = vld [vmem:[#allocation3 + $0x1a0] sm:$0xf0]  ;;  %v2521_v31 = vor.u32 %v2682_v53, %v2520_v18  ;;  %v2412_v42 = vld [vmem:[#allocation3 + $0x180] sm:$0xf] }
  0xfb   :  { %1561 = vmatpush.bf16.msra.mxu3 %v2533_v7  ;;  %v2425_v0 = vor.u32 %v2658_v19, %v2424_v34  ;;  %v2655_v29 = vld [vmem:[#allocation3 + $0x188] sm:$0xf0]  ;;  %v2508_v7 = vld [vmem:[#allocation3 + $0x240] sm:$0xf] }
  0xfc   :  { %v2413_v60 = vor.u32 %v2655_v29, %v2412_v42  ;;  %v2509_v19 = vor.u32 %v2679_v61, %v2508_v7 }
  0xfd   :  { %1465 = vmatpush.bf16.msra.mxu1 %v2317_v38 }
  0xfe   :  { %v3115_v37 = vpop.f32.mrf.mxu2  ;;  %v3117_v40 = vpop.f32.mrf.mxu3  ;;  %1513 = vmatpush.bf16.msra.mxu2 %v2425_v0 }
  0xff   :  { %v3119_v52 = vpop.f32.mrf.mxu0  ;;  %v3121_v39 = vpop.f32.mrf.mxu1  ;;  %1562 = vmatpush.bf16.msra.mxu3 %v2521_v31 }
 0x100   :  { %3686 = vst [vmem:[#allocation21_spill] sm:$0xff] %v3119_v52 }
 0x101   :  { %3687 = vst [vmem:[#allocation22_spill] sm:$0xff] %v3121_v39 }
 0x102   :  { %2193 = vmatmul.msk.bf16.gmra.mxu0 %vm370_vm2, %v75_v30  ;;  %2201 = vmatmul.msk.bf16.gmra.mxu1 %vm370_vm2, %v75_v30 }
 0x103   :  { %2209 = vmatmul.msk.bf16.gmra.mxu2 %vm370_vm2, %v75_v30  ;;  %2217 = vmatmul.msk.bf16.gmra.mxu3 %vm370_vm2, %v75_v30  ;;  %v591_v30 = vld [vmem:[%s3651_s4] sm:$0xf] }
 0x104   :  { %1514 = vmatpush.bf16.msra.mxu2 %v2413_v60  ;;  %1563 = vmatpush.bf16.msra.mxu3 %v2509_v19  ;;  %v3143_v53 = vperm.slane %v591_v30, 0  ;;  %v3146_v42 = vperm.slane %v591_v30, 1 }
 0x106   :  { %v3127_v18 = vpop.f32.mrf.mxu2  ;;  %v3129_v11 = vpop.f32.mrf.mxu3 }
 0x107   :  { %3688 = vst [vmem:[#allocation23_spill] sm:$0xff] %v3127_v18  ;;  %v3131_v22 = vpop.f32.mrf.mxu0  ;;  %v3133_v41 = vpop.f32.mrf.mxu1 }
 0x108   :  { %3689 = vst [vmem:[#allocation24_spill] sm:$0xff] %v3129_v11 }
 0x109   :  { %3690 = vst [vmem:[#allocation25_spill] sm:$0xff] %v3131_v22 }
 0x10a   :  { %3691 = vst [vmem:[#allocation26_spill] sm:$0xff] %v3133_v41  ;;  %v3158_v41 = vperm.slane %v591_v30, 3 }
 0x10e   :  { %v3135_v45 = vpop.f32.mrf.mxu2  ;;  %v3137_v8 = vpop.f32.mrf.mxu3 }
 0x10f   :  { %3692 = vst [vmem:[#allocation27_spill] sm:$0xff] %v3135_v45  ;;  %v404_v38 = vpop.f32.mrf.mxu0  ;;  %v453_v34 = vpop.f32.mrf.mxu1 }
 0x110   :  { %3693 = vst [vmem:[#allocation28_spill] sm:$0xff] %v3137_v8  ;;  %v405_v0 = vadd.f32 %v404_v38, %v2937_v54  ;;  %v454_v31 = vadd.f32 %v453_v34, %v2939_v55  ;;  %v3155_v34 = vperm.slane %v591_v30, 2 }
 0x112   :  { %v601_v19 = vadd.f32 %v3143_v53, %v405_v0  ;;  %v602_v8 = vadd.f32 %v3146_v42, %v454_v31 }
 0x114   :  { %v665_v22 = vmax.f32 %v601_v19, 0.0  ;;  %v666_v0 = vmax.f32 %v602_v8, 0.0 }
 0x116   :  { %v502_v29 = vpop.f32.mrf.mxu2  ;;  %v551_v7 = vpop.f32.mrf.mxu3 }
 0x117   :  { %v406_v60 = vpop.f32.mrf.mxu0  ;;  %v455_v61 = vpop.f32.mrf.mxu1  ;;  %v503_v55 = vadd.f32 %v502_v29, %v2945_v56  ;;  %v552_v18 = vadd.f32 %v551_v7, %v2947_v57 }
 0x118   :  { %v407_v45 = vadd.f32 %v406_v60, %v2949_v58  ;;  %v456_v11 = vadd.f32 %v455_v61, %v2951_v59 }
 0x119   :  { %v604_v56 = vadd.f32 %v3158_v41, %v552_v18 }
 0x11a   :  { %v605_v54 = vadd.f32 %v3143_v53, %v407_v45  ;;  %v606_v38 = vadd.f32 %v3146_v42, %v456_v11  ;;  %v603_v11 = vadd.f32 %v3155_v34, %v503_v55 }
 0x11b   :  { %v668_v60 = vmax.f32 %v604_v56, 0.0 }
 0x11c   :  { %v669_v39 = vmax.f32 %v605_v54, 0.0  ;;  %v670_v31 = vmax.f32 %v606_v38, 0.0  ;;  %v667_v8 = vmax.f32 %v603_v11, 0.0 }
 0x11e   :  { %v3160_v52 = vpack.c.bf16 %v669_v39, %v665_v22  ;;  %v3162_v58 = vpack.c.bf16 %v670_v31, %v666_v0  ;;  %v504_v59 = vpop.f32.mrf.mxu2  ;;  %v553_v45 = vpop.f32.mrf.mxu3 }
 0x11f   :  { %v505_v29 = vadd.f32 %v504_v59, %v2959_v62  ;;  %v554_v57 = vadd.f32 %v553_v45, %v2961_v63  ;;  %v409_v30 = vpop.f32.mrf.mxu0  ;;  %v458_v7 = vpop.f32.mrf.mxu1 }
 0x120   :  { %1417 = vmatmul.bf16.vlgmr.msra.gmra.mxu0 %v3160_v52  ;;  %1466 = vmatmul.bf16.vlgmr.msra.gmra.mxu1 %v3162_v58  ;;  %v410_v18 = vadd.f32 %v409_v30, %v2963_v1  ;;  %v459_v62 = vadd.f32 %v458_v7, %v2965_v2 }
 0x121   :  { %v607_v39 = vadd.f32 %v3155_v34, %v505_v29  ;;  %v608_v22 = vadd.f32 %v3158_v41, %v554_v57 }
 0x122   :  { %v609_v59 = vadd.f32 %v3143_v53, %v410_v18  ;;  %v610_v45 = vadd.f32 %v3146_v42, %v459_v62 }
 0x123   :  { %v671_v61 = vmax.f32 %v607_v39, 0.0  ;;  %v672_v19 = vmax.f32 %v608_v22, 0.0 }
 0x124   :  { %v673_v30 = vmax.f32 %v609_v59, 0.0  ;;  %v674_v7 = vmax.f32 %v610_v45, 0.0 }
 0x125   :  { %v3174_v54 = vpack.c.bf16 %v671_v61, %v667_v8  ;;  %v3176_v63 = vpack.c.bf16 %v672_v19, %v668_v60 }
 0x126   :  { %v507_v38 = vpop.f32.mrf.mxu2  ;;  %v556_v55 = vpop.f32.mrf.mxu3 }
 0x127   :  { %1515 = vmatmul.bf16.vlgmr.msra.gmra.mxu2 %v3174_v54  ;;  %1564 = vmatmul.bf16.vlgmr.msra.gmra.mxu3 %v3176_v63  ;;  %v411_v0 = vpop.f32.mrf.mxu0  ;;  %v460_v31 = vpop.f32.mrf.mxu1  ;;  %v508_v29 = vadd.f32 %v507_v38, %v2971_v3  ;;  %v557_v57 = vadd.f32 %v556_v55, %v2973_v4 }
 0x128   :  { %v412_v1 = vadd.f32 %v411_v0, %v2975_v5  ;;  %v461_v2 = vadd.f32 %v460_v31, %v2977_v6 }
 0x129   :  { %v611_v5 = vadd.f32 %v3155_v34, %v508_v29  ;;  %v612_v6 = vadd.f32 %v3158_v41, %v557_v57 }
 0x12a   :  { %v613_v11 = vadd.f32 %v3143_v53, %v412_v1  ;;  %v614_v56 = vadd.f32 %v3146_v42, %v461_v2 }
 0x12b   :  { %v675_v0 = vmax.f32 %v611_v5, 0.0  ;;  %v676_v31 = vmax.f32 %v612_v6, 0.0 }
 0x12c   :  { %v677_v39 = vmax.f32 %v613_v11, 0.0  ;;  %v678_v22 = vmax.f32 %v614_v56, 0.0 }
 0x12e   :  { %v509_v8 = vpop.f32.mrf.mxu2  ;;  %v558_v60 = vpop.f32.mrf.mxu3  ;;  %v3188_v61 = vpack.c.bf16 %v677_v39, %v673_v30  ;;  %v3190_v19 = vpack.c.bf16 %v678_v22, %v674_v7 }
 0x12f   :  { %v510_v18 = vadd.f32 %v509_v8, %v2985_v9  ;;  %v559_v3 = vadd.f32 %v558_v60, %v2987_v10  ;;  %v414_v62 = vpop.f32.mrf.mxu0  ;;  %v463_v4 = vpop.f32.mrf.mxu1 }
 0x130   :  { %1422 = vmatmul.bf16.gmra.mxu0 %v3188_v61  ;;  %1471 = vmatmul.bf16.gmra.mxu1 %v3190_v19  ;;  %v415_v1 = vadd.f32 %v414_v62, %v2989_v12  ;;  %v464_v9 = vadd.f32 %v463_v4, %v2991_v13 }
 0x131   :  { %v615_v38 = vadd.f32 %v3155_v34, %v510_v18  ;;  %v616_v55 = vadd.f32 %v3158_v41, %v559_v3 }
 0x132   :  { %v617_v30 = vadd.f32 %v3143_v53, %v415_v1  ;;  %v618_v7 = vadd.f32 %v3146_v42, %v464_v9 }
 0x133   :  { %v679_v59 = vmax.f32 %v615_v38, 0.0  ;;  %v680_v45 = vmax.f32 %v616_v55, 0.0 }
 0x134   :  { %v681_v5 = vmax.f32 %v617_v30, 0.0  ;;  %v682_v6 = vmax.f32 %v618_v7, 0.0 }
 0x135   :  { %v3202_v2 = vpack.c.bf16 %v679_v59, %v675_v0  ;;  %v3204_v10 = vpack.c.bf16 %v680_v45, %v676_v31 }
 0x136   :  { %v512_v11 = vpop.f32.mrf.mxu2  ;;  %v561_v56 = vpop.f32.mrf.mxu3 }
 0x137   :  { %1520 = vmatmul.bf16.gmra.mxu2 %v3202_v2  ;;  %1569 = vmatmul.bf16.gmra.mxu3 %v3204_v10  ;;  %v416_v29 = vpop.f32.mrf.mxu0  ;;  %v465_v57 = vpop.f32.mrf.mxu1  ;;  %v513_v39 = vadd.f32 %v512_v11, %v2997_v14  ;;  %v562_v22 = vadd.f32 %v561_v56, %v2999_v15 }
 0x138   :  { %v417_v12 = vadd.f32 %v416_v29, %v3001_v16  ;;  %v466_v13 = vadd.f32 %v465_v57, %v3003_v17 }
 0x139   :  { %v619_v62 = vadd.f32 %v3155_v34, %v513_v39  ;;  %v620_v4 = vadd.f32 %v3158_v41, %v562_v22 }
 0x13a   :  { %v621_v8 = vadd.f32 %v3143_v53, %v417_v12  ;;  %v622_v60 = vadd.f32 %v3146_v42, %v466_v13 }
 0x13b   :  { %v683_v1 = vmax.f32 %v619_v62, 0.0  ;;  %v684_v9 = vmax.f32 %v620_v4, 0.0 }
 0x13c   :  { %v685_v18 = vmax.f32 %v621_v8, 0.0  ;;  %v686_v3 = vmax.f32 %v622_v60, 0.0 }
 0x13e   :  { %v514_v38 = vpop.f32.mrf.mxu2  ;;  %v563_v16 = vpop.f32.mrf.mxu3  ;;  %v3218_v55 = vpack.c.bf16 %v685_v18, %v681_v5  ;;  %v3220_v17 = vpack.c.bf16 %v686_v3, %v682_v6 }
 0x13f   :  { %v515_v14 = vadd.f32 %v514_v38, %v3011_v20  ;;  %v564_v15 = vadd.f32 %v563_v16, %v3013_v21  ;;  %v419_v0 = vpop.f32.mrf.mxu0  ;;  %v468_v31 = vpop.f32.mrf.mxu1  ;;  %v2675_v38 = vld [vmem:[#allocation3 + $0x22c] sm:$0xf]  ;;  %v2498_v16 = vld [vmem:[#allocation3 + $0x234] sm:$0xf0] }
 0x140   :  { %1427 = vmatmul.bf16.gmra.mxu0 %v3218_v55  ;;  %1476 = vmatmul.bf16.gmra.mxu1 %v3220_v17  ;;  %v420_v29 = vadd.f32 %v419_v0, %v3015_v23  ;;  %v469_v20 = vadd.f32 %v468_v31, %v3017_v24  ;;  %v2306_v0 = vld [vmem:[#allocation3 + $0xb4] sm:$0xf0] }
 0x141   :  { %v623_v59 = vadd.f32 %v3155_v34, %v515_v14  ;;  %v624_v45 = vadd.f32 %v3158_v41, %v564_v15  ;;  %v2501_v15 = vor.u32 %v2675_v38, %v2498_v16 }
 0x142   :  { %v625_v12 = vadd.f32 %v3143_v53, %v420_v29  ;;  %v626_v13 = vadd.f32 %v3146_v42, %v469_v20 }
 0x143   :  { %v687_v11 = vmax.f32 %v623_v59, 0.0  ;;  %v688_v56 = vmax.f32 %v624_v45, 0.0  ;;  %1703 = vmatpush.bf16.msrb.mxu2 %v2501_v15 }
 0x144   :  { %v689_v18 = vmax.f32 %v625_v12, 0.0  ;;  %v690_v3 = vmax.f32 %v626_v13, 0.0 }
 0x145   :  { %v3230_v57 = vpack.c.bf16 %v687_v11, %v683_v1  ;;  %v3232_v21 = vpack.c.bf16 %v688_v56, %v684_v9  ;;  %v2594_v9 = vld [vmem:[#allocation3 + $0x2f4] sm:$0xf0]  ;;  %v2651_v11 = vld [vmem:[#allocation3 + $0x16c] sm:$0xf] }
 0x146   :  { %v517_v30 = vpop.f32.mrf.mxu2  ;;  %v566_v7 = vpop.f32.mrf.mxu3  ;;  %v2402_v56 = vld [vmem:[#allocation3 + $0x174] sm:$0xf0] }
 0x147   :  { %1525 = vmatmul.bf16.gmra.mxu2 %v3230_v57  ;;  %1574 = vmatmul.bf16.gmra.mxu3 %v3232_v21  ;;  %v421_v39 = vpop.f32.mrf.mxu0  ;;  %v470_v22 = vpop.f32.mrf.mxu1  ;;  %v518_v8 = vadd.f32 %v517_v30, %v3023_v25  ;;  %v567_v60 = vadd.f32 %v566_v7, %v3025_v26  ;;  %v2405_v13 = vor.u32 %v2651_v11, %v2402_v56 }
 0x148   :  { %v422_v23 = vadd.f32 %v421_v39, %v3027_v27  ;;  %v471_v24 = vadd.f32 %v470_v22, %v3029_v28  ;;  %v2627_v27 = vld [vmem:[#allocation3 + $0xac] sm:$0xf] }
 0x149   :  { %v627_v14 = vadd.f32 %v3155_v34, %v518_v8  ;;  %v2699_v28 = vld [vmem:[#allocation3 + $0x2ec] sm:$0xf]  ;;  %v628_v25 = vadd.f32 %v3158_v41, %v567_v60  ;;  %v2309_v1 = vor.u32 %v2627_v27, %v2306_v0  ;;  %1654 = vmatpush.bf16.msrb.mxu1 %v2405_v13  ;;  %v2582_v13 = vld [vmem:[#allocation3 + $0x2dc] sm:$0xf0] }
 0x14a   :  { %v629_v5 = vadd.f32 %v3143_v53, %v422_v23  ;;  %v630_v6 = vadd.f32 %v3146_v42, %v471_v24  ;;  %v2597_v12 = vor.u32 %v2699_v28, %v2594_v9  ;;  %v2486_v9 = vld [vmem:[#allocation3 + $0x21c] sm:$0xf0] }
 0x14b   :  { %1605 = vmatpush.bf16.msrb.mxu0 %v2309_v1  ;;  %v691_v23 = vmax.f32 %v627_v14, 0.0  ;;  %v692_v24 = vmax.f32 %v628_v25, 0.0  ;;  %v2672_v1 = vld [vmem:[#allocation3 + $0x214] sm:$0xf] }
 0x14c   :  { %v693_v62 = vmax.f32 %v629_v5, 0.0  ;;  %v694_v4 = vmax.f32 %v630_v6, 0.0  ;;  %1752 = vmatpush.bf16.msrb.mxu3 %v2597_v12  ;;  %v2489_v56 = vor.u32 %v2672_v1, %v2486_v9  ;;  %v3699_v9 = vld [vmem:[#allocation12_spill] sm:$0xff] }
 0x14e   :  { %v519_v31 = vpop.f32.mrf.mxu2  ;;  %v568_v26 = vpop.f32.mrf.mxu3  ;;  %v3246_v59 = vpack.c.bf16 %v693_v62, %v689_v18  ;;  %v3248_v45 = vpack.c.bf16 %v694_v4, %v690_v3  ;;  %1704 = vmatpush.bf16.msrb.mxu2 %v2489_v56 }
 0x14f   :  { %v520_v29 = vadd.f32 %v519_v31, %v3037_v43  ;;  %v569_v20 = vadd.f32 %v568_v26, %v3039_v44  ;;  %v424_v30 = vpop.f32.mrf.mxu0  ;;  %v473_v7 = vpop.f32.mrf.mxu1 }
 0x150   :  { %1432 = vmatmul.bf16.gmra.mxu0 %v3246_v59  ;;  %1481 = vmatmul.bf16.gmra.mxu1 %v3248_v45  ;;  %v425_v8 = vadd.f32 %v424_v30, %v3041_v46  ;;  %v474_v60 = vadd.f32 %v473_v7, %v3043_v47 }
 0x151   :  { %v631_v39 = vadd.f32 %v3155_v34, %v520_v29  ;;  %v632_v22 = vadd.f32 %v3158_v41, %v569_v20  ;;  %v2294_v29 = vld [vmem:[#allocation3 + $0x9c] sm:$0xf0] }
 0x152   :  { %v633_v62 = vadd.f32 %v3143_v53, %v425_v8  ;;  %v634_v4 = vadd.f32 %v3146_v42, %v474_v60 }
 0x153   :  { %v695_v43 = vmax.f32 %v631_v39, 0.0  ;;  %v696_v44 = vmax.f32 %v632_v22, 0.0  ;;  %v2648_v39 = vld [vmem:[#allocation3 + $0x154] sm:$0xf]  ;;  %v2390_v22 = vld [vmem:[#allocation3 + $0x15c] sm:$0xf0] }
 0x154   :  { %v697_v28 = vmax.f32 %v633_v62, 0.0  ;;  %v698_v25 = vmax.f32 %v634_v4, 0.0  ;;  %v2393_v60 = vor.u32 %v2648_v39, %v2390_v22 }
 0x155   :  { %v3258_v5 = vpack.c.bf16 %v695_v43, %v691_v23  ;;  %v3260_v6 = vpack.c.bf16 %v696_v44, %v692_v24 }
 0x156   :  { %v522_v18 = vpop.f32.mrf.mxu2  ;;  %v571_v3 = vpop.f32.mrf.mxu3  ;;  %1655 = vmatpush.bf16.msrb.mxu1 %v2393_v60  ;;  %v2474_v60 = vld [vmem:[#allocation3 + $0x204] sm:$0xf0] }
 0x157   :  { %1530 = vmatmul.bf16.gmra.mxu2 %v3258_v5  ;;  %1579 = vmatmul.bf16.gmra.mxu3 %v3260_v6  ;;  %v426_v38 = vpop.f32.mrf.mxu0  ;;  %v475_v16 = vpop.f32.mrf.mxu1  ;;  %v523_v14 = vadd.f32 %v522_v18, %v3049_v48  ;;  %v572_v15 = vadd.f32 %v571_v3, %v3051_v49 }
 0x158   :  { %v427_v46 = vadd.f32 %v426_v38, %v3053_v50  ;;  %v476_v47 = vadd.f32 %v475_v16, %v3055_v51  ;;  %v2624_v50 = vld [vmem:[#allocation3 + $0x94] sm:$0xf] }
 0x159   :  { %v635_v11 = vadd.f32 %v3155_v34, %v523_v14  ;;  %v2696_v51 = vld [vmem:[#allocation3 + $0x2d4] sm:$0xf]  ;;  %v636_v48 = vadd.f32 %v3158_v41, %v572_v15  ;;  %v2297_v12 = vor.u32 %v2624_v50, %v2294_v29  ;;  %v2378_v50 = vld [vmem:[#allocation3 + $0x144] sm:$0xf0] }
 0x15a   :  { %v637_v27 = vadd.f32 %v3143_v53, %v427_v46  ;;  %v638_v0 = vadd.f32 %v3146_v42, %v476_v47  ;;  %v2585_v8 = vor.u32 %v2696_v51, %v2582_v13  ;;  %v3700_v29 = vld [vmem:[#allocation9_spill] sm:$0xff] }
 0x15b   :  { %1606 = vmatpush.bf16.msrb.mxu0 %v2297_v12  ;;  %v699_v62 = vmax.f32 %v635_v11, 0.0  ;;  %v700_v4 = vmax.f32 %v636_v48, 0.0 }
 0x15c   :  { %v701_v31 = vmax.f32 %v637_v27, 0.0  ;;  %v702_v26 = vmax.f32 %v638_v0, 0.0  ;;  %1753 = vmatpush.bf16.msrb.mxu3 %v2585_v8  ;;  %v2669_v8 = vld [vmem:[#allocation3 + $0x1fc] sm:$0xf] }
 0x15e   :  { %v524_v20 = vpop.f32.mrf.mxu2  ;;  %v573_v49 = vpop.f32.mrf.mxu3  ;;  %v3274_v30 = vpack.c.bf16 %v701_v31, %v697_v28  ;;  %v3276_v7 = vpack.c.bf16 %v702_v26, %v698_v25  ;;  %v2621_v31 = vld [vmem:[#allocation3 + $0x7c] sm:$0xf] }
 0x15f   :  { %v525_v23 = vadd.f32 %v524_v20, %v3063_v32  ;;  %v574_v24 = vadd.f32 %v573_v49, %v3065_v33  ;;  %v429_v43 = vpop.f32.mrf.mxu0  ;;  %v478_v44 = vpop.f32.mrf.mxu1  ;;  %v2645_v26 = vld [vmem:[#allocation3 + $0x13c] sm:$0xf]  ;;  %v3701_v20 = vld [vmem:[#allocation10_spill] sm:$0xff] }
 0x160   :  { %3694 = vst [vmem:[#allocation29_spill] sm:$0xff] %v3274_v30  ;;  %1437 = vmatmul.bf16.gmra.mxu0 %v3274_v30  ;;  %1486 = vmatmul.bf16.gmra.mxu1 %v3276_v7  ;;  %v430_v38 = vadd.f32 %v429_v43, %v3067_v35  ;;  %v479_v16 = vadd.f32 %v478_v44, %v3069_v36  ;;  %v2282_v35 = vld [vmem:[#allocation3 + $0x84] sm:$0xf0]  ;;  %v3698_v36 = vld [vmem:[#allocation11_spill] sm:$0xff] }
 0x161   :  { %3695 = vst [vmem:[#allocation30_spill] sm:$0xff] %v3276_v7  ;;  %v639_v18 = vadd.f32 %v3155_v34, %v525_v23  ;;  %v640_v3 = vadd.f32 %v3158_v41, %v574_v24  ;;  %v2285_v56 = vor.u32 %v2621_v31, %v2282_v35  ;;  %v2381_v48 = vor.u32 %v2645_v26, %v2378_v50  ;;  %v2618_v23 = vld [vmem:[#allocation3 + $0x64] sm:$0xf]  ;;  %v2270_v24 = vld [vmem:[#allocation3 + $0x6c] sm:$0xf0] }
 0x162   :  { %v641_v27 = vadd.f32 %v3143_v53, %v430_v38  ;;  %v642_v0 = vadd.f32 %v3146_v42, %v479_v16  ;;  %v3705_v35 = vld [vmem:[#allocation14_spill] sm:$0xff] }
 0x163   :  { %v703_v32 = vmax.f32 %v639_v18, 0.0  ;;  %v704_v33 = vmax.f32 %v640_v3, 0.0  ;;  %1607 = vmatpush.bf16.msrb.mxu0 %v2285_v56  ;;  %1656 = vmatpush.bf16.msrb.mxu1 %v2381_v48  ;;  %v2273_v18 = vor.u32 %v2618_v23, %v2270_v24  ;;  %v2258_v56 = vld [vmem:[#allocation3 + $0x54] sm:$0xf0]  ;;  %v2639_v50 = vld [vmem:[#allocation3 + $0x10c] sm:$0xf] }
 0x164   :  { %v705_v39 = vmax.f32 %v641_v27, 0.0  ;;  %v706_v22 = vmax.f32 %v642_v0, 0.0  ;;  %v3706_v24 = vld [vmem:[#allocation15_spill] sm:$0xff] }
 0x165   :  { %v3286_v46 = vpack.c.bf16 %v703_v32, %v699_v62  ;;  %v3288_v47 = vpack.c.bf16 %v704_v33, %v700_v4  ;;  %v2477_v62 = vor.u32 %v2669_v8, %v2474_v60  ;;  %v2693_v4 = vld [vmem:[#allocation3 + $0x2bc] sm:$0xf]  ;;  %v2570_v32 = vld [vmem:[#allocation3 + $0x2c4] sm:$0xf0]  ;;  %v2642_v33 = vld [vmem:[#allocation3 + $0x124] sm:$0xf] }
 0x166   :  { %v527_v14 = vpop.f32.mrf.mxu2  ;;  %v576_v15 = vpop.f32.mrf.mxu3  ;;  %v2573_v0 = vor.u32 %v2693_v4, %v2570_v32  ;;  %v2558_v8 = vld [vmem:[#allocation3 + $0x2ac] sm:$0xf0] }
 0x167   :  { %3696 = vst [vmem:[#allocation31_spill] sm:$0xff] %v3286_v46  ;;  %1535 = vmatmul.bf16.gmra.mxu2 %v3286_v46  ;;  %1584 = vmatmul.bf16.gmra.mxu3 %v3288_v47  ;;  %v431_v28 = vpop.f32.mrf.mxu0  ;;  %v480_v25 = vpop.f32.mrf.mxu1  ;;  %v528_v51 = vadd.f32 %v527_v14, %v3700_v29  ;;  %v577_v49 = vadd.f32 %v576_v15, %v3701_v20 }
 0x168   :  { %3697 = vst [vmem:[#allocation32_spill] sm:$0xff] %v3288_v47  ;;  %v432_v1 = vadd.f32 %v431_v28, %v3698_v36  ;;  %v481_v11 = vadd.f32 %v480_v25, %v3699_v9  ;;  %1608 = vmatpush.bf16.msrb.mxu0 %v2273_v18  ;;  %v2366_v28 = vld [vmem:[#allocation3 + $0x12c] sm:$0xf0]  ;;  %v3704_v25 = vld [vmem:[#allocation13_spill] sm:$0xff]  ;;  %1705 = vmatpush.bf16.msrb.mxu2 %v2477_v62  ;;  %v3707_v62 = vld [vmem:[#allocation16_spill] sm:$0xff] }
 0x169   :  { %v643_v3 = vadd.f32 %v3155_v34, %v528_v51  ;;  %v644_v38 = vadd.f32 %v3158_v41, %v577_v49  ;;  %v2369_v9 = vor.u32 %v2642_v33, %v2366_v28  ;;  %v2354_v51 = vld [vmem:[#allocation3 + $0x114] sm:$0xf0]  ;;  %1754 = vmatpush.bf16.msrb.mxu3 %v2573_v0  ;;  %v2612_v33 = vld [vmem:[#allocation3 + $0x34] sm:$0xf]  ;;  %v2342_v28 = vld [vmem:[#allocation3 + $0xfc] sm:$0xf0] }
 0x16a   :  { %v645_v12 = vadd.f32 %v3143_v53, %v432_v1  ;;  %v646_v13 = vadd.f32 %v3146_v42, %v481_v11  ;;  %v2615_v11 = vld [vmem:[#allocation3 + $0x4c] sm:$0xf]  ;;  %v2357_v49 = vor.u32 %v2639_v50, %v2354_v51  ;;  %v2636_v0 = vld [vmem:[#allocation3 + $0xf4] sm:$0xf] }
 0x16b   :  { %v2261_v29 = vor.u32 %v2615_v11, %v2258_v56  ;;  %1657 = vmatpush.bf16.msrb.mxu1 %v2369_v9  ;;  %v708_v23 = vmax.f32 %v644_v38, 0.0  ;;  %v2345_v38 = vor.u32 %v2636_v0, %v2342_v28  ;;  %v2546_v11 = vld [vmem:[#allocation3 + $0x294] sm:$0xf0] }
 0x16c   :  { %v709_v43 = vmax.f32 %v645_v12, 0.0  ;;  %v710_v44 = vmax.f32 %v646_v13, 0.0  ;;  %v2666_v12 = vld [vmem:[#allocation3 + $0x1e4] sm:$0xf]  ;;  %v2462_v13 = vld [vmem:[#allocation3 + $0x1ec] sm:$0xf0] }
 0x16d   :  { %1609 = vmatpush.bf16.msrb.mxu0 %v2261_v29 }
 0x16e   :  { %v529_v16 = vpop.f32.mrf.mxu2  ;;  %v578_v14 = vpop.f32.mrf.mxu3  ;;  %v3302_v15 = vpack.c.bf16 %v709_v43, %v705_v39  ;;  %v3304_v27 = vpack.c.bf16 %v710_v44, %v706_v22  ;;  %v2690_v39 = vld [vmem:[#allocation3 + $0x2a4] sm:$0xf]  ;;  %v707_v22 = vmax.f32 %v643_v3, 0.0  ;;  %v2465_v44 = vor.u32 %v2666_v12, %v2462_v13  ;;  %v2633_v12 = vld [vmem:[#allocation3 + $0xdc] sm:$0xf]  ;;  %v3710_v13 = vld [vmem:[#allocation19_spill] sm:$0xff] }
 0x16f   :  { %v530_v31 = vadd.f32 %v529_v16, %v3704_v25  ;;  %v579_v26 = vadd.f32 %v578_v14, %v3705_v35  ;;  %v434_v36 = vpop.f32.mrf.mxu0  ;;  %v483_v1 = vpop.f32.mrf.mxu1  ;;  %v2561_v32 = vor.u32 %v2690_v39, %v2558_v8  ;;  %v2246_v16 = vld [vmem:[#allocation3 + $0x3c] sm:$0xf0]  ;;  %1658 = vmatpush.bf16.msrb.mxu1 %v2357_v49  ;;  %v2450_v35 = vld [vmem:[#allocation3 + $0x1d4] sm:$0xf0]  ;;  %v2234_v49 = vld [vmem:[#allocation3 + $0x24] sm:$0xf0] }
 0x170   :  { %3702 = vst [vmem:[#allocation11_spill] sm:$0xff] %v3302_v15  ;;  %1442 = vmatmul.bf16.gmra.mxu0 %v3302_v15  ;;  %1491 = vmatmul.bf16.gmra.mxu1 %v3304_v27  ;;  %v435_v43 = vadd.f32 %v434_v36, %v3706_v24  ;;  %v484_v4 = vadd.f32 %v483_v1, %v3707_v62  ;;  %v2438_v8 = vld [vmem:[#allocation3 + $0x1bc] sm:$0xf0] }
 0x171   :  { %3703 = vst [vmem:[#allocation12_spill] sm:$0xff] %v3304_v27  ;;  %v647_v48 = vadd.f32 %v3155_v34, %v530_v31  ;;  %v648_v20 = vadd.f32 %v3158_v41, %v579_v26  ;;  %1706 = vmatpush.bf16.msrb.mxu2 %v2465_v44  ;;  %v2249_v14 = vor.u32 %v2612_v33, %v2246_v16  ;;  %v2663_v31 = vld [vmem:[#allocation3 + $0x1cc] sm:$0xf]  ;;  %v2330_v44 = vld [vmem:[#allocation3 + $0xe4] sm:$0xf0] }
 0x172   :  { %1755 = vmatpush.bf16.msrb.mxu3 %v2561_v32  ;;  %v2687_v26 = vld [vmem:[#allocation3 + $0x28c] sm:$0xf]  ;;  %v2453_v1 = vor.u32 %v2663_v31, %v2450_v35  ;;  %v649_v56 = vadd.f32 %v3143_v53, %v435_v43  ;;  %v650_v50 = vadd.f32 %v3146_v42, %v484_v4  ;;  %v2660_v43 = vld [vmem:[#allocation3 + $0x1b4] sm:$0xf]  ;;  %v2333_v62 = vor.u32 %v2633_v12, %v2330_v44  ;;  %v2534_v32 = vld [vmem:[#allocation3 + $0x27c] sm:$0xf0] }
 0x173   :  { %v711_v60 = vmax.f32 %v647_v48, 0.0  ;;  %v712_v18 = vmax.f32 %v648_v20, 0.0  ;;  %1610 = vmatpush.bf16.msrb.mxu0 %v2249_v14  ;;  %v2549_v48 = vor.u32 %v2687_v26, %v2546_v11  ;;  %v2609_v20 = vld [vmem:[#allocation3 + $0x1c] sm:$0xf]  ;;  %1659 = vmatpush.bf16.msrb.mxu1 %v2345_v38  ;;  %v2684_v4 = vld [vmem:[#allocation3 + $0x274] sm:$0xf]  ;;  %v2441_v14 = vor.u32 %v2660_v43, %v2438_v8 }
 0x174   :  { %v2237_v24 = vor.u32 %v2609_v20, %v2234_v49  ;;  %v2537_v0 = vor.u32 %v2684_v4, %v2534_v32  ;;  %v713_v28 = vmax.f32 %v649_v56, 0.0  ;;  %v714_v31 = vmax.f32 %v650_v50, 0.0  ;;  %v3713_v35 = vld [vmem:[#allocation18_spill] sm:$0xff]  ;;  %v2657_v49 = vld [vmem:[#allocation3 + $0x19c] sm:$0xf] }
 0x175   :  { %v3314_v25 = vpack.c.bf16 %v711_v60, %v707_v22  ;;  %v3316_v3 = vpack.c.bf16 %v712_v18, %v708_v23  ;;  %v3711_v22 = vld [vmem:[#allocation20_spill] sm:$0xff]  ;;  %1707 = vmatpush.bf16.msrb.mxu2 %v2453_v1  ;;  %v3712_v60 = vld [vmem:[#allocation17_spill] sm:$0xff]  ;;  %v2222_v38 = vld [vmem:[#allocation3 + $0xc] sm:$0xf0] }
 0x176   :  { %v532_v36 = vpop.f32.mrf.mxu2  ;;  %v581_v9 = vpop.f32.mrf.mxu3  ;;  %1756 = vmatpush.bf16.msrb.mxu3 %v2549_v48  ;;  %v2606_v1 = vld [vmem:[#allocation3 + $0x4] sm:$0xf]  ;;  %v2318_v20 = vld [vmem:[#allocation3 + $0xcc] sm:$0xf0]  ;;  %v2426_v12 = vld [vmem:[#allocation3 + $0x1a4] sm:$0xf0] }
 0x177   :  { %3708 = vst [vmem:[#allocation9_spill] sm:$0xff] %v3314_v25  ;;  %1540 = vmatmul.bf16.gmra.mxu2 %v3314_v25  ;;  %1589 = vmatmul.bf16.gmra.mxu3 %v3316_v3  ;;  %v436_v29 = vpop.f32.mrf.mxu0  ;;  %v485_v51 = vpop.f32.mrf.mxu1  ;;  %v533_v18 = vadd.f32 %v532_v36, %v3712_v60  ;;  %v582_v26 = vadd.f32 %v581_v9, %v3713_v35  ;;  %v2630_v36 = vld [vmem:[#allocation3 + $0xc4] sm:$0xf]  ;;  %v2414_v32 = vld [vmem:[#allocation3 + $0x18c] sm:$0xf0] }
 0x178   :  { %3709 = vst [vmem:[#allocation10_spill] sm:$0xff] %v3316_v3  ;;  %v437_v39 = vadd.f32 %v436_v29, %v3710_v13  ;;  %v486_v23 = vadd.f32 %v485_v51, %v3711_v22  ;;  %1611 = vmatpush.bf16.msrb.mxu0 %v2237_v24  ;;  %1660 = vmatpush.bf16.msrb.mxu1 %v2333_v62  ;;  %v2522_v24 = vld [vmem:[#allocation3 + $0x264] sm:$0xf0]  ;;  %v2654_v4 = vld [vmem:[#allocation3 + $0x184] sm:$0xf] }
 0x179   :  { %1708 = vmatpush.bf16.msrb.mxu2 %v2441_v14  ;;  %v651_v51 = vadd.f32 %v3155_v34, %v533_v18  ;;  %v2225_v48 = vor.u32 %v2606_v1, %v2222_v38  ;;  %v2321_v9 = vor.u32 %v2630_v36, %v2318_v20  ;;  %v2429_v22 = vor.u32 %v2657_v49, %v2426_v12  ;;  %v3716_v1 = vld [vmem:[#allocation21_spill] sm:$0xff] }
 0x17a   :  { %v653_v33 = vadd.f32 %v3143_v53, %v437_v39  ;;  %v654_v16 = vadd.f32 %v3146_v42, %v486_v23  ;;  %1757 = vmatpush.bf16.msrb.mxu3 %v2537_v0  ;;  %v2681_v23 = vld [vmem:[#allocation3 + $0x25c] sm:$0xf]  ;;  %v652_v44 = vadd.f32 %v3158_v41, %v582_v26  ;;  %v2510_v0 = vld [vmem:[#allocation3 + $0x24c] sm:$0xf0] }
 0x17b   :  { %v2525_v62 = vor.u32 %v2681_v23, %v2522_v24  ;;  %v3721_v23 = vld [vmem:[#allocation26_spill] sm:$0xff] }
 0x17c   :  { %v717_v11 = vmax.f32 %v653_v33, 0.0  ;;  %v718_v29 = vmax.f32 %v654_v16, 0.0  ;;  %1612 = vmatpush.bf16.msrb.mxu0 %v2225_v48  ;;  %v2678_v33 = vld [vmem:[#allocation3 + $0x244] sm:$0xf]  ;;  %1661 = vmatpush.bf16.msrb.mxu1 %v2321_v9 }
 0x17d   :  { %1709 = vmatpush.bf16.msrb.mxu2 %v2429_v22  ;;  %v3720_v9 = vld [vmem:[#allocation25_spill] sm:$0xff] }
 0x17e   :  { %v534_v13 = vpop.f32.mrf.mxu2  ;;  %v583_v39 = vpop.f32.mrf.mxu3  ;;  %v3329_v56 = vpack.c.bf16 %v717_v11, %v713_v28  ;;  %v3331_v50 = vpack.c.bf16 %v718_v29, %v714_v31  ;;  %1758 = vmatpush.bf16.msrb.mxu3 %v2525_v62  ;;  %v715_v28 = vmax.f32 %v651_v51, 0.0  ;;  %v716_v31 = vmax.f32 %v652_v44, 0.0  ;;  %v3717_v29 = vld [vmem:[#allocation22_spill] sm:$0xff] }
 0x17f   :  { %v535_v43 = vadd.f32 %v534_v13, %v3115_v37  ;;  %v584_v8 = vadd.f32 %v583_v39, %v3117_v40  ;;  %v439_v60 = vpop.f32.mrf.mxu0  ;;  %v488_v18 = vpop.f32.mrf.mxu1  ;;  %v2417_v37 = vor.u32 %v2654_v4, %v2414_v32  ;;  %v2513_v40 = vor.u32 %v2678_v33, %v2510_v0 }
 0x180   :  { %3714 = vst [vmem:[#allocation13_spill] sm:$0xff] %v3329_v56  ;;  %1447 = vmatmul.bf16.gmra.mxu0 %v3329_v56  ;;  %1496 = vmatmul.bf16.gmra.mxu1 %v3331_v50  ;;  %v440_v11 = vadd.f32 %v439_v60, %v3716_v1  ;;  %v489_v38 = vadd.f32 %v488_v18, %v3717_v29  ;;  %v3723_v18 = vld [vmem:[#allocation24_spill] sm:$0xff] }
 0x181   :  { %3715 = vst [vmem:[#allocation14_spill] sm:$0xff] %v3331_v50  ;;  %v655_v16 = vadd.f32 %v3155_v34, %v535_v43  ;;  %v656_v14 = vadd.f32 %v3158_v41, %v584_v8  ;;  %1710 = vmatpush.bf16.msrb.mxu2 %v2417_v37  ;;  %v3722_v8 = vld [vmem:[#allocation23_spill] sm:$0xff] }
 0x182   :  { %1759 = vmatpush.bf16.msrb.mxu3 %v2513_v40  ;;  %v657_v13 = vadd.f32 %v3143_v53, %v440_v11  ;;  %v658_v39 = vadd.f32 %v3146_v42, %v489_v38 }
 0x183   :  { %v719_v35 = vmax.f32 %v655_v16, 0.0  ;;  %v720_v26 = vmax.f32 %v656_v14, 0.0 }
 0x184   :  { %v721_v4 = vmax.f32 %v657_v13, 0.0  ;;  %v722_v32 = vmax.f32 %v658_v39, 0.0  ;;  %v3377_v13 = vld [vmem:[%s3653_s6] sm:$0x7] }
 0x185   :  { %v3342_v36 = vpack.c.bf16 %v719_v35, %v715_v28  ;;  %v3344_v48 = vpack.c.bf16 %v720_v26, %v716_v31  ;;  %v3726_v31 = vld [vmem:[#allocation27_spill] sm:$0xff]  ;;  %v3727_v35 = vld [vmem:[#allocation28_spill] sm:$0xff]  ;;  %3730 = vst [vmem:[#allocation21_spill] sm:$0xff] %v3377_v13 }
 0x186   :  { %v537_v20 = vpop.f32.mrf.mxu2  ;;  %v586_v49 = vpop.f32.mrf.mxu3 }
 0x187   :  { %3718 = vst [vmem:[#allocation15_spill] sm:$0xff] %v3342_v36  ;;  %1545 = vmatmul.bf16.gmra.mxu2 %v3342_v36  ;;  %1594 = vmatmul.bf16.gmra.mxu3 %v3344_v48  ;;  %v441_v51 = vpop.f32.mrf.mxu0  ;;  %v490_v12 = vpop.f32.mrf.mxu1  ;;  %v538_v60 = vadd.f32 %v537_v20, %v3722_v8  ;;  %v587_v62 = vadd.f32 %v586_v49, %v3723_v18 }
 0x188   :  { %3719 = vst [vmem:[#allocation16_spill] sm:$0xff] %v3344_v48  ;;  %v442_v22 = vadd.f32 %v441_v51, %v3720_v9  ;;  %v491_v24 = vadd.f32 %v490_v12, %v3721_v23 }
 0x189   :  { %v659_v28 = vadd.f32 %v3155_v34, %v538_v60 }
 0x18a   :  { %v661_v44 = vadd.f32 %v3143_v53, %v442_v22  ;;  %v662_v43 = vadd.f32 %v3146_v42, %v491_v24  ;;  %v660_v53 = vadd.f32 %v3158_v41, %v587_v62 }
 0x18b   :  { %v723_v29 = vmax.f32 %v659_v28, 0.0 }
 0x18c   :  { %v725_v33 = vmax.f32 %v661_v44, 0.0  ;;  %v726_v16 = vmax.f32 %v662_v43, 0.0  ;;  %v724_v38 = vmax.f32 %v660_v53, 0.0 }
 0x18e   :  { %v539_v14 = vpop.f32.mrf.mxu2  ;;  %v588_v37 = vpop.f32.mrf.mxu3  ;;  %v3356_v0 = vpack.c.bf16 %v725_v33, %v721_v4  ;;  %v3358_v40 = vpack.c.bf16 %v726_v16, %v722_v32 }
 0x18f   :  { %v540_v42 = vadd.f32 %v539_v14, %v3726_v31  ;;  %v589_v26 = vadd.f32 %v588_v37, %v3727_v35 }
 0x190   :  { %3724 = vst [vmem:[#allocation19_spill] sm:$0xff] %v3356_v0  ;;  %1452 = vmatmul.bf16.gmra.mxu0 %v3356_v0  ;;  %1501 = vmatmul.bf16.gmra.mxu1 %v3358_v40 }
 0x191   :  { %3725 = vst [vmem:[#allocation20_spill] sm:$0xff] %v3358_v40  ;;  %v663_v1 = vadd.f32 %v3155_v34, %v540_v42  ;;  %v664_v11 = vadd.f32 %v3158_v41, %v589_v26  ;;  %v3380_v34 = vperm.slane %v3377_v13, 0 }
 0x193   :  { %v727_v20 = vmax.f32 %v663_v1, 0.0  ;;  %v728_v49 = vmax.f32 %v664_v11, 0.0 }
 0x195   :  { %v3368_v51 = vpack.c.bf16 %v727_v20, %v723_v29  ;;  %v3370_v12 = vpack.c.bf16 %v728_v49, %v724_v38 }
 0x197   :  { %3728 = vst [vmem:[#allocation17_spill] sm:$0xff] %v3368_v51  ;;  %1550 = vmatmul.bf16.gmra.mxu2 %v3368_v51  ;;  %1599 = vmatmul.bf16.gmra.mxu3 %v3370_v12 }
 0x198   :  { %3729 = vst [vmem:[#allocation18_spill] sm:$0xff] %v3370_v12 }
 0x19d   :  { %v1418_v41 = vpop.f32.mrf.mxu0  ;;  %v1467_v39 = vpop.f32.mrf.mxu1 }
 0x19e   :  { %v1419_v9 = vadd.f32 %v1418_v41, %v3380_v34 }
 0x1a0   :  { %v1468_v22 = vadd.f32 %v1467_v39, %v1419_v9  ;;  %1613 = vmatmul.bf16.vlgmr.msrb.gmra.mxu0 %v3160_v52  ;;  %1662 = vmatmul.bf16.vlgmr.msrb.gmra.mxu1 %v3162_v58 }
 0x1a5   :  { %v1420_v23 = vpop.f32.mrf.mxu0  ;;  %v1469_v24 = vpop.f32.mrf.mxu1 }
 0x1a6   :  { %v1421_v44 = vadd.f32 %v1420_v23, %v3380_v34 }
 0x1a7   :  { %1711 = vmatmul.bf16.vlgmr.msrb.gmra.mxu2 %v3174_v54  ;;  %1760 = vmatmul.bf16.vlgmr.msrb.gmra.mxu3 %v3176_v63 }
 0x1a8   :  { %v1470_v43 = vadd.f32 %v1469_v24, %v1421_v44 }
 0x1aa   :  { %v1516_v8 = vpop.f32.mrf.mxu2  ;;  %v1565_v60 = vpop.f32.mrf.mxu3 }
 0x1ab   :  { %v1517_v18 = vadd.f32 %v1516_v8, %v1468_v22 }
 0x1ad   :  { %v3388_v62 = vadd.f32 %v1565_v60, %v1517_v18  ;;  %v1423_v4 = vpop.f32.mrf.mxu0  ;;  %v1472_v32 = vpop.f32.mrf.mxu1  ;;  %v2504_v18 = vld [vmem:[#allocation3 + $0x230] sm:$0xf] }
 0x1ae   :  { %v1424_v33 = vadd.f32 %v1423_v4, %v3380_v34  ;;  %v2677_v4 = vld [vmem:[#allocation3 + $0x238] sm:$0xf0] }
 0x1af   :  { %3731 = vst [vmem:[#allocation22_spill] sm:$0xff] %v3388_v62 }
 0x1b0   :  { %v1473_v16 = vadd.f32 %v1472_v32, %v1424_v33  ;;  %1618 = vmatmul.bf16.gmra.mxu0 %v3188_v61  ;;  %1667 = vmatmul.bf16.gmra.mxu1 %v3190_v19  ;;  %v2505_v32 = vor.u32 %v2677_v4, %v2504_v18 }
 0x1b2   :  { %v1518_v14 = vpop.f32.mrf.mxu2  ;;  %v1567_v37 = vpop.f32.mrf.mxu3  ;;  %1899 = vmatpush.bf16.msra.mxu2 %v2505_v32 }
 0x1b3   :  { %v1519_v28 = vadd.f32 %v1518_v14, %v1470_v43 }
 0x1b5   :  { %v3393_v53 = vadd.f32 %v1567_v37, %v1519_v28  ;;  %v1425_v31 = vpop.f32.mrf.mxu0  ;;  %v1474_v42 = vpop.f32.mrf.mxu1 }
 0x1b6   :  { %v1426_v35 = vadd.f32 %v1425_v31, %v3380_v34 }
 0x1b7   :  { %3732 = vst [vmem:[#allocation25_spill] sm:$0xff] %v3393_v53  ;;  %1716 = vmatmul.bf16.gmra.mxu2 %v3202_v2  ;;  %1765 = vmatmul.bf16.gmra.mxu3 %v3204_v10 }
 0x1b8   :  { %v1475_v26 = vadd.f32 %v1474_v42, %v1426_v35  ;;  %v2312_v35 = vld [vmem:[#allocation3 + $0xb0] sm:$0xf] }
 0x1ba   :  { %v1521_v1 = vpop.f32.mrf.mxu2  ;;  %v1570_v11 = vpop.f32.mrf.mxu3 }
 0x1bb   :  { %v1522_v29 = vadd.f32 %v1521_v1, %v1473_v16 }
 0x1bd   :  { %v3398_v38 = vadd.f32 %v1570_v11, %v1522_v29  ;;  %v1428_v20 = vpop.f32.mrf.mxu0  ;;  %v1477_v49 = vpop.f32.mrf.mxu1  ;;  %v2600_v29 = vld [vmem:[#allocation3 + $0x2f0] sm:$0xf] }
 0x1be   :  { %v1429_v41 = vadd.f32 %v1428_v20, %v3380_v34  ;;  %v2701_v20 = vld [vmem:[#allocation3 + $0x2f8] sm:$0xf0] }
 0x1c0   :  { %v1478_v39 = vadd.f32 %v1477_v49, %v1429_v41  ;;  %1623 = vmatmul.bf16.gmra.mxu0 %v3218_v55  ;;  %1672 = vmatmul.bf16.gmra.mxu1 %v3220_v17  ;;  %v2408_v49 = vld [vmem:[#allocation3 + $0x170] sm:$0xf]  ;;  %v2601_v41 = vor.u32 %v2701_v20, %v2600_v29  ;;  %v2300_v29 = vld [vmem:[#allocation3 + $0x98] sm:$0xf]  ;;  %v2626_v20 = vld [vmem:[#allocation3 + $0xa0] sm:$0xf0] }
 0x1c2   :  { %v1523_v9 = vpop.f32.mrf.mxu2  ;;  %v1572_v22 = vpop.f32.mrf.mxu3  ;;  %1948 = vmatpush.bf16.msra.mxu3 %v2601_v41  ;;  %v2301_v41 = vor.u32 %v2626_v20, %v2300_v29  ;;  %v2384_v20 = vld [vmem:[#allocation3 + $0x140] sm:$0xf] }
 0x1c3   :  { %v1524_v23 = vadd.f32 %v1523_v9, %v1475_v26  ;;  %v2629_v26 = vld [vmem:[#allocation3 + $0xb8] sm:$0xf0] }
 0x1c4   :  { %v2313_v11 = vor.u32 %v2629_v26, %v2312_v35 }
 0x1c5   :  { %v3403_v24 = vadd.f32 %v1572_v22, %v1524_v23  ;;  %v1430_v44 = vpop.f32.mrf.mxu0  ;;  %v1479_v43 = vpop.f32.mrf.mxu1 }
 0x1c6   :  { %v1431_v8 = vadd.f32 %v1430_v44, %v3380_v34  ;;  %1801 = vmatpush.bf16.msra.mxu0 %v2313_v11 }
 0x1c7   :  { %1721 = vmatmul.bf16.gmra.mxu2 %v3230_v57  ;;  %1770 = vmatmul.bf16.gmra.mxu3 %v3232_v21 }
 0x1c8   :  { %v1480_v60 = vadd.f32 %v1479_v43, %v1431_v8 }
 0x1ca   :  { %v1526_v33 = vpop.f32.mrf.mxu2  ;;  %v1575_v16 = vpop.f32.mrf.mxu3  ;;  %1802 = vmatpush.bf16.msra.mxu0 %v2301_v41  ;;  %v2647_v41 = vld [vmem:[#allocation3 + $0x148] sm:$0xf0] }
 0x1cb   :  { %v1527_v14 = vadd.f32 %v1526_v33, %v1478_v39  ;;  %v2653_v39 = vld [vmem:[#allocation3 + $0x178] sm:$0xf0]  ;;  %v2492_v33 = vld [vmem:[#allocation3 + $0x218] sm:$0xf] }
 0x1cc   :  { %v2409_v23 = vor.u32 %v2653_v39, %v2408_v49  ;;  %v2588_v39 = vld [vmem:[#allocation3 + $0x2d8] sm:$0xf] }
 0x1cd   :  { %v3408_v37 = vadd.f32 %v1575_v16, %v1527_v14  ;;  %v1433_v28 = vpop.f32.mrf.mxu0  ;;  %v1482_v31 = vpop.f32.mrf.mxu1  ;;  %v2674_v16 = vld [vmem:[#allocation3 + $0x220] sm:$0xf0] }
 0x1ce   :  { %v1434_v42 = vadd.f32 %v1433_v28, %v3380_v34  ;;  %1850 = vmatpush.bf16.msra.mxu1 %v2409_v23  ;;  %v2493_v14 = vor.u32 %v2674_v16, %v2492_v33 }
 0x1d0   :  { %v1483_v1 = vadd.f32 %v1482_v31, %v1434_v42  ;;  %1628 = vmatmul.bf16.gmra.mxu0 %v3246_v59  ;;  %1677 = vmatmul.bf16.gmra.mxu1 %v3248_v45 }
 0x1d1   :  { %1900 = vmatpush.bf16.msra.mxu2 %v2493_v14 }
 0x1d2   :  { %v1528_v9 = vpop.f32.mrf.mxu2  ;;  %v1577_v22 = vpop.f32.mrf.mxu3 }
 0x1d3   :  { %v1529_v44 = vadd.f32 %v1528_v9, %v1480_v60  ;;  %v2698_v9 = vld [vmem:[#allocation3 + $0x2e0] sm:$0xf0] }
 0x1d4   :  { %v2589_v23 = vor.u32 %v2698_v9, %v2588_v39 }
 0x1d5   :  { %v3413_v43 = vadd.f32 %v1577_v22, %v1529_v44  ;;  %v1435_v8 = vpop.f32.mrf.mxu0  ;;  %v1484_v18 = vpop.f32.mrf.mxu1  ;;  %v2396_v22 = vld [vmem:[#allocation3 + $0x158] sm:$0xf] }
 0x1d6   :  { %v1436_v4 = vadd.f32 %v1435_v8, %v3380_v34  ;;  %1949 = vmatpush.bf16.msra.mxu3 %v2589_v23 }
 0x1d7   :  { %1726 = vmatmul.bf16.gmra.mxu2 %v3258_v5  ;;  %1775 = vmatmul.bf16.gmra.mxu3 %v3260_v6 }
 0x1d8   :  { %v1485_v32 = vadd.f32 %v1484_v18, %v1436_v4 }
 0x1da   :  { %v1531_v28 = vpop.f32.mrf.mxu2  ;;  %v1580_v31 = vpop.f32.mrf.mxu3 }
 0x1db   :  { %v1532_v42 = vadd.f32 %v1531_v28, %v1483_v1  ;;  %v2650_v1 = vld [vmem:[#allocation3 + $0x160] sm:$0xf0] }
 0x1dc   :  { %v2397_v18 = vor.u32 %v2650_v1, %v2396_v22  ;;  %v2385_v22 = vor.u32 %v2647_v41, %v2384_v20  ;;  %v2276_v1 = vld [vmem:[#allocation3 + $0x68] sm:$0xf]  ;;  %v2641_v41 = vld [vmem:[#allocation3 + $0x118] sm:$0xf0] }
 0x1dd   :  { %v3418_v60 = vadd.f32 %v1580_v31, %v1532_v42  ;;  %v1438_v35 = vpop.f32.mrf.mxu0  ;;  %v1487_v26 = vpop.f32.mrf.mxu1  ;;  %v2288_v31 = vld [vmem:[#allocation3 + $0x80] sm:$0xf]  ;;  %v2623_v42 = vld [vmem:[#allocation3 + $0x88] sm:$0xf0] }
 0x1de   :  { %v1439_v11 = vadd.f32 %v1438_v35, %v3380_v34  ;;  %1851 = vmatpush.bf16.msra.mxu1 %v2397_v18  ;;  %v2289_v29 = vor.u32 %v2623_v42, %v2288_v31  ;;  %v2576_v31 = vld [vmem:[#allocation3 + $0x2c0] sm:$0xf]  ;;  %v2695_v42 = vld [vmem:[#allocation3 + $0x2c8] sm:$0xf0] }
 0x1e0   :  { %v1488_v49 = vadd.f32 %v1487_v26, %v1439_v11  ;;  %1633 = vmatmul.bf16.gmra.mxu0 %v3274_v30  ;;  %1682 = vmatmul.bf16.gmra.mxu1 %v3276_v7  ;;  %v2480_v26 = vld [vmem:[#allocation3 + $0x200] sm:$0xf]  ;;  %v2671_v11 = vld [vmem:[#allocation3 + $0x208] sm:$0xf0] }
 0x1e1   :  { %1803 = vmatpush.bf16.msra.mxu0 %v2289_v29  ;;  %v2264_v29 = vld [vmem:[#allocation3 + $0x50] sm:$0xf] }
 0x1e2   :  { %v1533_v44 = vpop.f32.mrf.mxu2  ;;  %v1582_v8 = vpop.f32.mrf.mxu3  ;;  %1852 = vmatpush.bf16.msra.mxu1 %v2385_v22  ;;  %v2668_v22 = vld [vmem:[#allocation3 + $0x1f0] sm:$0xf0] }
 0x1e3   :  { %v1534_v4 = vadd.f32 %v1533_v44, %v1485_v32  ;;  %v2481_v32 = vor.u32 %v2671_v11, %v2480_v26  ;;  %v2620_v44 = vld [vmem:[#allocation3 + $0x70] sm:$0xf0]  ;;  %v2577_v11 = vor.u32 %v2695_v42, %v2576_v31  ;;  %v2252_v42 = vld [vmem:[#allocation3 + $0x38] sm:$0xf] }
 0x1e4   :  { %v2277_v18 = vor.u32 %v2620_v44, %v2276_v1 }
 0x1e5   :  { %v3423_v33 = vadd.f32 %v1582_v8, %v1534_v4  ;;  %v1440_v16 = vpop.f32.mrf.mxu0  ;;  %v1489_v14 = vpop.f32.mrf.mxu1  ;;  %1901 = vmatpush.bf16.msra.mxu2 %v2481_v32  ;;  %v2372_v8 = vld [vmem:[#allocation3 + $0x128] sm:$0xf]  ;;  %v2644_v4 = vld [vmem:[#allocation3 + $0x130] sm:$0xf0]  ;;  %v2360_v32 = vld [vmem:[#allocation3 + $0x110] sm:$0xf]  ;;  %1950 = vmatpush.bf16.msra.mxu3 %v2577_v11 }
 0x1e6   :  { %v1441_v28 = vadd.f32 %v1440_v16, %v3380_v34  ;;  %v2373_v26 = vor.u32 %v2644_v4, %v2372_v8  ;;  %1804 = vmatpush.bf16.msra.mxu0 %v2277_v18  ;;  %v2692_v18 = vld [vmem:[#allocation3 + $0x2b0] sm:$0xf0] }
 0x1e7   :  { %1731 = vmatmul.bf16.gmra.mxu2 %v3286_v46  ;;  %1780 = vmatmul.bf16.gmra.mxu3 %v3288_v47  ;;  %v2348_v47 = vld [vmem:[#allocation3 + $0xf8] sm:$0xf] }
 0x1e8   :  { %v1490_v35 = vadd.f32 %v1489_v14, %v1441_v28  ;;  %1853 = vmatpush.bf16.msra.mxu1 %v2373_v26 }
 0x1ea   :  { %v1536_v39 = vpop.f32.mrf.mxu2  ;;  %v1585_v9 = vpop.f32.mrf.mxu3 }
 0x1eb   :  { %v1537_v23 = vadd.f32 %v1536_v39, %v1488_v49  ;;  %v2617_v49 = vld [vmem:[#allocation3 + $0x58] sm:$0xf0]  ;;  %v2361_v39 = vor.u32 %v2641_v41, %v2360_v32 }
 0x1ec   :  { %v2265_v20 = vor.u32 %v2617_v49, %v2264_v29  ;;  %v2638_v49 = vld [vmem:[#allocation3 + $0x100] sm:$0xf0]  ;;  %v2665_v41 = vld [vmem:[#allocation3 + $0x1d8] sm:$0xf0] }
 0x1ed   :  { %v3428_v16 = vadd.f32 %v1585_v9, %v1537_v23  ;;  %v3430_v14 = vpop.f32.mrf.mxu0  ;;  %v3432_v28 = vpop.f32.mrf.mxu1  ;;  %v2468_v9 = vld [vmem:[#allocation3 + $0x1e8] sm:$0xf]  ;;  %1854 = vmatpush.bf16.msra.mxu1 %v2361_v39  ;;  %v2349_v32 = vor.u32 %v2638_v49, %v2348_v47  ;;  %v2444_v39 = vld [vmem:[#allocation3 + $0x1b8] sm:$0xf] }
 0x1ee   :  { %v2564_v23 = vld [vmem:[#allocation3 + $0x2a8] sm:$0xf]  ;;  %1805 = vmatpush.bf16.msra.mxu0 %v2265_v20  ;;  %v2469_v8 = vor.u32 %v2668_v22, %v2468_v9  ;;  %v2456_v20 = vld [vmem:[#allocation3 + $0x1d0] sm:$0xf]  ;;  %v2689_v22 = vld [vmem:[#allocation3 + $0x298] sm:$0xf0] }
 0x1ef   :  { %v2565_v31 = vor.u32 %v2692_v18, %v2564_v23  ;;  %v2552_v9 = vld [vmem:[#allocation3 + $0x290] sm:$0xf]  ;;  %v2240_v23 = vld [vmem:[#allocation3 + $0x20] sm:$0xf]  ;;  %v2635_v18 = vld [vmem:[#allocation3 + $0xe8] sm:$0xf0] }
 0x1f0   :  { %1638 = vmatmul.bf16.gmra.mxu0 %v3302_v15  ;;  %1687 = vmatmul.bf16.gmra.mxu1 %v3304_v27  ;;  %v2614_v15 = vld [vmem:[#allocation3 + $0x40] sm:$0xf0] }
 0x1f1   :  { %1902 = vmatpush.bf16.msra.mxu2 %v2469_v8  ;;  %v2253_v29 = vor.u32 %v2614_v15, %v2252_v42  ;;  %1951 = vmatpush.bf16.msra.mxu3 %v2565_v31  ;;  %v2553_v15 = vor.u32 %v2689_v22, %v2552_v9  ;;  %v2336_v8 = vld [vmem:[#allocation3 + $0xe0] sm:$0xf]  ;;  %v2540_v31 = vld [vmem:[#allocation3 + $0x278] sm:$0xf]  ;;  %v2228_v9 = vld [vmem:[#allocation3 + $0x8] sm:$0xf] }
 0x1f2   :  { %v1538_v1 = vpop.f32.mrf.mxu2  ;;  %v1587_v44 = vpop.f32.mrf.mxu3  ;;  %1855 = vmatpush.bf16.msra.mxu1 %v2349_v32  ;;  %v2337_v47 = vor.u32 %v2635_v18, %v2336_v8  ;;  %v2608_v22 = vld [vmem:[#allocation3 + $0x10] sm:$0xf0]  ;;  %v2432_v18 = vld [vmem:[#allocation3 + $0x1a0] sm:$0xf] }
 0x1f3   :  { %v1539_v4 = vadd.f32 %v1538_v1, %v1490_v35  ;;  %1806 = vmatpush.bf16.msra.mxu0 %v2253_v29  ;;  %v2457_v35 = vor.u32 %v2665_v41, %v2456_v20  ;;  %v2611_v1 = vld [vmem:[#allocation3 + $0x28] sm:$0xf0]  ;;  %v2686_v20 = vld [vmem:[#allocation3 + $0x280] sm:$0xf0] }
 0x1f4   :  { %v2541_v41 = vor.u32 %v2686_v20, %v2540_v31  ;;  %v2420_v31 = vld [vmem:[#allocation3 + $0x188] sm:$0xf] }
 0x1f5   :  { %v3436_v27 = vadd.f32 %v1587_v44, %v1539_v4  ;;  %v3438_v26 = vpop.f32.mrf.mxu0  ;;  %v3440_v11 = vpop.f32.mrf.mxu1  ;;  %1903 = vmatpush.bf16.msra.mxu2 %v2457_v35  ;;  %v2241_v44 = vor.u32 %v2611_v1, %v2240_v23  ;;  %1952 = vmatpush.bf16.msra.mxu3 %v2553_v15  ;;  %v2662_v4 = vld [vmem:[#allocation3 + $0x1c0] sm:$0xf0]  ;;  %v2324_v35 = vld [vmem:[#allocation3 + $0xc8] sm:$0xf]  ;;  %v2229_v23 = vor.u32 %v2608_v22, %v2228_v9  ;;  %v2632_v1 = vld [vmem:[#allocation3 + $0xd0] sm:$0xf0] }
 0x1f6   :  { %v2445_v49 = vor.u32 %v2662_v4, %v2444_v39  ;;  %1856 = vmatpush.bf16.msra.mxu1 %v2337_v47  ;;  %v2325_v8 = vor.u32 %v2632_v1, %v2324_v35  ;;  %v2683_v39 = vld [vmem:[#allocation3 + $0x268] sm:$0xf0]  ;;  %v2516_v20 = vld [vmem:[#allocation3 + $0x248] sm:$0xf]  ;;  %v2680_v22 = vld [vmem:[#allocation3 + $0x250] sm:$0xf0] }
 0x1f7   :  { %1736 = vmatmul.bf16.gmra.mxu2 %v3314_v25  ;;  %1785 = vmatmul.bf16.gmra.mxu3 %v3316_v3  ;;  %v2659_v3 = vld [vmem:[#allocation3 + $0x1a8] sm:$0xf0] }
 0x1f8   :  { %1807 = vmatpush.bf16.msra.mxu0 %v2241_v44  ;;  %v2433_v25 = vor.u32 %v2659_v3, %v2432_v18  ;;  %v2528_v44 = vld [vmem:[#allocation3 + $0x260] sm:$0xf]  ;;  %v2517_v3 = vor.u32 %v2680_v22, %v2516_v20 }
 0x1f9   :  { %1904 = vmatpush.bf16.msra.mxu2 %v2445_v49  ;;  %1953 = vmatpush.bf16.msra.mxu3 %v2541_v41  ;;  %v2529_v4 = vor.u32 %v2683_v39, %v2528_v44  ;;  %v2656_v49 = vld [vmem:[#allocation3 + $0x190] sm:$0xf0] }
 0x1fa   :  { %v3444_v42 = vpop.f32.mrf.mxu2  ;;  %v3446_v29 = vpop.f32.mrf.mxu3  ;;  %1857 = vmatpush.bf16.msra.mxu1 %v2325_v8  ;;  %v2421_v41 = vor.u32 %v2656_v49, %v2420_v31 }
 0x1fc   :  { %1808 = vmatpush.bf16.msra.mxu0 %v2229_v23 }
 0x1fd   :  { %v1448_v32 = vpop.f32.mrf.mxu0  ;;  %v3448_v15 = vpop.f32.mrf.mxu1  ;;  %1905 = vmatpush.bf16.msra.mxu2 %v2433_v25  ;;  %1954 = vmatpush.bf16.msra.mxu3 %v2529_v4 }
 0x200   :  { %1643 = vmatmul.bf16.gmra.mxu0 %v3329_v56  ;;  %1692 = vmatmul.bf16.gmra.mxu1 %v3331_v50 }
 0x201   :  { %1906 = vmatpush.bf16.msra.mxu2 %v2421_v41  ;;  %1955 = vmatpush.bf16.msra.mxu3 %v2517_v3  ;;  %v3463_v41 = vperm.slane %v3377_v13, 1 }
 0x202   :  { %v3452_v9 = vpop.f32.mrf.mxu2  ;;  %v3454_v47 = vpop.f32.mrf.mxu3 }
 0x205   :  { %v1450_v35 = vpop.f32.mrf.mxu0  ;;  %v1499_v23 = vpop.f32.mrf.mxu1 }
 0x207   :  { %1741 = vmatmul.bf16.gmra.mxu2 %v3342_v36  ;;  %1790 = vmatmul.bf16.gmra.mxu3 %v3344_v48 }
 0x20a   :  { %v1546_v25 = vpop.f32.mrf.mxu2  ;;  %v1595_v1 = vpop.f32.mrf.mxu3 }
 0x20d   :  { %v1453_v8 = vpop.f32.mrf.mxu0  ;;  %v1502_v18 = vpop.f32.mrf.mxu1 }
 0x20e   :  { %v1454_v22 = vadd.f32 %v1453_v8, %v3380_v34  ;;  %v1449_v8 = vadd.f32 %v1448_v32, %v3380_v34 }
 0x210   :  { %1648 = vmatmul.bf16.gmra.mxu0 %v3356_v0  ;;  %1697 = vmatmul.bf16.gmra.mxu1 %v3358_v40 }
 0x212   :  { %v1548_v44 = vpop.f32.mrf.mxu2  ;;  %v1597_v39 = vpop.f32.mrf.mxu3 }
 0x215   :  { %v1455_v4 = vpop.f32.mrf.mxu0  ;;  %v1504_v31 = vpop.f32.mrf.mxu1 }
 0x216   :  { %v1456_v3 = vadd.f32 %v1455_v4, %v3380_v34 }
 0x217   :  { %1746 = vmatmul.bf16.gmra.mxu2 %v3368_v51  ;;  %1795 = vmatmul.bf16.gmra.mxu3 %v3370_v12  ;;  %v1451_v12 = vadd.f32 %v1450_v35, %v3380_v34  ;;  %v1503_v51 = vadd.f32 %v1502_v18, %v1454_v22 }
 0x218   :  { %v1505_v50 = vadd.f32 %v1504_v31, %v1456_v3 }
 0x219   :  { %v1500_v4 = vadd.f32 %v1499_v23, %v1451_v12 }
 0x21a   :  { %v1551_v49 = vpop.f32.mrf.mxu2  ;;  %v1600_v20 = vpop.f32.mrf.mxu3 }
 0x21b   :  { %v1552_v46 = vadd.f32 %v1551_v49, %v1503_v51  ;;  %v1446_v51 = vadd.f32 %v3438_v26, %v3380_v34 }
 0x21d   :  { %v1614_v0 = vpop.f32.mrf.mxu0  ;;  %v1663_v48 = vpop.f32.mrf.mxu1 }
 0x21e   :  { %v1615_v40 = vadd.f32 %v1614_v0, %v3463_v41  ;;  %v1549_v0 = vadd.f32 %v1548_v44, %v1500_v4 }
 0x220   :  { %v1664_v36 = vadd.f32 %v1663_v48, %v1615_v40  ;;  %1809 = vmatmul.bf16.vlgmr.msra.gmra.mxu0 %v3160_v52  ;;  %1858 = vmatmul.bf16.vlgmr.msra.gmra.mxu1 %v3162_v58  ;;  %v1601_v52 = vadd.f32 %v1600_v20, %v1552_v46 }
 0x222   :  { %v1553_v56 = vpop.f32.mrf.mxu2  ;;  %v1602_v13 = vpop.f32.mrf.mxu3  ;;  %v2039_v32 = vmax.f32 %v1601_v52, 0.0  ;;  %v2021_v52 = vmax.f32 %v3428_v16, 0.0  ;;  %v2015_v16 = vmax.f32 %v3418_v60, 0.0  ;;  %v2009_v60 = vmax.f32 %v3408_v37, 0.0 }
 0x223   :  { %v1554_v62 = vadd.f32 %v1553_v56, %v1505_v50  ;;  %v1498_v56 = vadd.f32 %v3448_v15, %v1449_v8  ;;  %v2003_v37 = vmax.f32 %v3398_v38, 0.0 }
 0x225   :  { %v1603_v7 = vadd.f32 %v1602_v13, %v1554_v62  ;;  %v1616_v30 = vpop.f32.mrf.mxu0  ;;  %v1665_v53 = vpop.f32.mrf.mxu1  ;;  %v1547_v13 = vadd.f32 %v1546_v25, %v1498_v56  ;;  %v1598_v62 = vadd.f32 %v1597_v39, %v1549_v0 }
 0x226   :  { %v1617_v48 = vadd.f32 %v1616_v30, %v3463_v41 }
 0x227   :  { %v2042_v40 = vmax.f32 %v1603_v7, 0.0  ;;  %1907 = vmatmul.bf16.vlgmr.msra.gmra.mxu2 %v3174_v54  ;;  %1956 = vmatmul.bf16.vlgmr.msra.gmra.mxu3 %v3176_v63  ;;  %v1444_v7 = vadd.f32 %v3430_v14, %v3380_v34  ;;  %v1495_v54 = vadd.f32 %v3440_v11, %v1446_v51  ;;  %v1596_v35 = vadd.f32 %v1595_v1, %v1547_v13 }
 0x228   :  { %v1666_v58 = vadd.f32 %v1665_v53, %v1617_v48  ;;  %v2036_v23 = vmax.f32 %v1598_v62, 0.0 }
 0x229   :  { %2060 = vmatpush.xpose.msrb.mxu0 %v2042_v40  ;;  %v1544_v15 = vadd.f32 %v3452_v9, %v1495_v54  ;;  %v2033_v44 = vmax.f32 %v1596_v35, 0.0 }
 0x22a   :  { %v1712_v50 = vpop.f32.mrf.mxu2  ;;  %v1761_v12 = vpop.f32.mrf.mxu3 }
 0x22b   :  { %v1713_v30 = vadd.f32 %v1712_v50, %v1664_v36  ;;  %v1493_v36 = vadd.f32 %v3432_v28, %v1444_v7  ;;  %v1593_v18 = vadd.f32 %v3454_v47, %v1544_v15 }
 0x22d   :  { %v3481_v46 = vadd.f32 %v1761_v12, %v1713_v30  ;;  %2061 = vmatpush.xpose.msrb.mxu0 %v2039_v32  ;;  %v1619_v63 = vpop.f32.mrf.mxu0  ;;  %v1668_v53 = vpop.f32.mrf.mxu1  ;;  %v1542_v11 = vadd.f32 %v3444_v42, %v1493_v36  ;;  %v2030_v49 = vmax.f32 %v1593_v18, 0.0  ;;  %v3734_v18 = vld [vmem:[#allocation29_spill] sm:$0xff] }
 0x22e   :  { %v1620_v26 = vadd.f32 %v1619_v63, %v3463_v41 }
 0x230   :  { %v1669_v25 = vadd.f32 %v1668_v53, %v1620_v26  ;;  %1814 = vmatmul.bf16.gmra.mxu0 %v3188_v61  ;;  %1863 = vmatmul.bf16.gmra.mxu1 %v3190_v19  ;;  %v1591_v19 = vadd.f32 %v3446_v29, %v1542_v11  ;;  %v2024_v29 = vmax.f32 %v3436_v27, 0.0  ;;  %v2018_v27 = vmax.f32 %v3423_v33, 0.0  ;;  %v3733_v11 = vld [vmem:[#allocation25_spill] sm:$0xff] }
 0x231   :  { %2062 = vmatpush.xpose.msrb.mxu0 %v2036_v23  ;;  %v2012_v33 = vmax.f32 %v3413_v43, 0.0  ;;  %v2006_v43 = vmax.f32 %v3403_v24, 0.0  ;;  %v2000_v24 = vmax.f32 %v3733_v11, 0.0 }
 0x232   :  { %v1714_v34 = vpop.f32.mrf.mxu2  ;;  %v1763_v14 = vpop.f32.mrf.mxu3  ;;  %v2027_v20 = vmax.f32 %v1591_v19, 0.0 }
 0x233   :  { %v1715_v39 = vadd.f32 %v1714_v34, %v1666_v58 }
 0x235   :  { %v3490_v31 = vadd.f32 %v1763_v14, %v1715_v39  ;;  %2063 = vmatpush.xpose.msrb.mxu0 %v2033_v44  ;;  %v1621_v9 = vpop.f32.mrf.mxu0  ;;  %v1670_v1 = vpop.f32.mrf.mxu1  ;;  %v3736_v39 = vld [vmem:[#allocation22_spill] sm:$0xff] }
 0x236   :  { %v1622_v61 = vadd.f32 %v1621_v9, %v3463_v41  ;;  %v1997_v9 = vmax.f32 %v3736_v39, 0.0 }
 0x237   :  { %1912 = vmatmul.bf16.gmra.mxu2 %v3202_v2  ;;  %1961 = vmatmul.bf16.gmra.mxu3 %v3204_v10 }
 0x238   :  { %v1671_v28 = vadd.f32 %v1670_v1, %v1622_v61 }
 0x239   :  { %2064 = vmatpush.xpose.msrb.mxu0 %v2030_v49 }
 0x23a   :  { %v1717_v42 = vpop.f32.mrf.mxu2  ;;  %v1766_v47 = vpop.f32.mrf.mxu3 }
 0x23b   :  { %v1718_v22 = vadd.f32 %v1717_v42, %v1669_v25  ;;  %v3738_v42 = vld [vmem:[#allocation32_spill] sm:$0xff] }
 0x23d   :  { %v3496_v3 = vadd.f32 %v1766_v47, %v1718_v22  ;;  %2065 = vmatpush.xpose.msrb.mxu0 %v2027_v20  ;;  %v1624_v8 = vpop.f32.mrf.mxu0  ;;  %v1673_v4 = vpop.f32.mrf.mxu1 }
 0x23e   :  { %v1625_v48 = vadd.f32 %v1624_v8, %v3463_v41 }
 0x240   :  { %v1674_v0 = vadd.f32 %v1673_v4, %v1625_v48  ;;  %1819 = vmatmul.bf16.gmra.mxu0 %v3218_v55  ;;  %1868 = vmatmul.bf16.gmra.mxu1 %v3220_v17  ;;  %v3739_v48 = vld [vmem:[#allocation11_spill] sm:$0xff] }
 0x241   :  { %2066 = vmatpush.xpose.msrb.mxu0 %v2024_v29  ;;  %v3740_v29 = vld [vmem:[#allocation12_spill] sm:$0xff] }
 0x242   :  { %v1719_v2 = vpop.f32.mrf.mxu2  ;;  %v1768_v10 = vpop.f32.mrf.mxu3 }
 0x243   :  { %v1720_v40 = vadd.f32 %v1719_v2, %v1671_v28  ;;  %v3737_v28 = vld [vmem:[#allocation31_spill] sm:$0xff] }
 0x245   :  { %v3503_v58 = vadd.f32 %v1768_v10, %v1720_v40  ;;  %2067 = vmatpush.xpose.msrb.mxu0 %v2021_v52  ;;  %v1626_v51 = vpop.f32.mrf.mxu0  ;;  %v1675_v56 = vpop.f32.mrf.mxu1 }
 0x246   :  { %v1627_v50 = vadd.f32 %v1626_v51, %v3463_v41 }
 0x247   :  { %1917 = vmatmul.bf16.gmra.mxu2 %v3230_v57  ;;  %1966 = vmatmul.bf16.gmra.mxu3 %v3232_v21 }
 0x248   :  { %v1676_v55 = vadd.f32 %v1675_v56, %v1627_v50  ;;  %v3741_v56 = vld [vmem:[#allocation9_spill] sm:$0xff]  ;;  %v3742_v50 = vld [vmem:[#allocation10_spill] sm:$0xff] }
 0x249   :  { %2068 = vmatpush.xpose.msrb.mxu0 %v2018_v27 }
 0x24a   :  { %v1722_v17 = vpop.f32.mrf.mxu2  ;;  %v1771_v12 = vpop.f32.mrf.mxu3 }
 0x24b   :  { %v1723_v13 = vadd.f32 %v1722_v17, %v1674_v0 }
 0x24d   :  { %v3510_v62 = vadd.f32 %v1771_v12, %v1723_v13  ;;  %2069 = vmatpush.xpose.msrb.mxu0 %v2015_v16  ;;  %v1629_v32 = vpop.f32.mrf.mxu0  ;;  %v1678_v30 = vpop.f32.mrf.mxu1  ;;  %v3743_v16 = vld [vmem:[#allocation13_spill] sm:$0xff]  ;;  %v3744_v13 = vld [vmem:[#allocation14_spill] sm:$0xff] }
 0x24e   :  { %v1630_v7 = vadd.f32 %v1629_v32, %v3463_v41 }
 0x250   :  { %v1679_v54 = vadd.f32 %v1678_v30, %v1630_v7  ;;  %1824 = vmatmul.bf16.gmra.mxu0 %v3246_v59  ;;  %1873 = vmatmul.bf16.gmra.mxu1 %v3248_v45 }
 0x251   :  { %2070 = vmatpush.xpose.msrb.mxu0 %v2012_v33 }
 0x252   :  { %v1724_v57 = vpop.f32.mrf.mxu2  ;;  %v1773_v21 = vpop.f32.mrf.mxu3 }
 0x253   :  { %v1725_v63 = vadd.f32 %v1724_v57, %v1676_v55  ;;  %v3746_v57 = vld [vmem:[#allocation16_spill] sm:$0xff] }
 0x255   :  { %v3517_v53 = vadd.f32 %v1773_v21, %v1725_v63  ;;  %2071 = vmatpush.xpose.msrb.mxu0 %v2009_v60  ;;  %v1631_v26 = vpop.f32.mrf.mxu0  ;;  %v1680_v15 = vpop.f32.mrf.mxu1 }
 0x256   :  { %v1632_v35 = vadd.f32 %v1631_v26, %v3463_v41 }
 0x257   :  { %1922 = vmatmul.bf16.gmra.mxu2 %v3258_v5  ;;  %1971 = vmatmul.bf16.gmra.mxu3 %v3260_v6  ;;  %v3735_v5 = vld [vmem:[#allocation30_spill] sm:$0xff] }
 0x258   :  { %v1681_v59 = vadd.f32 %v1680_v15, %v1632_v35  ;;  %v3747_v15 = vld [vmem:[#allocation19_spill] sm:$0xff]  ;;  %v3748_v35 = vld [vmem:[#allocation20_spill] sm:$0xff] }
 0x259   :  { %2072 = vmatpush.xpose.msrb.mxu0 %v2006_v43 }
 0x25a   :  { %v1727_v45 = vpop.f32.mrf.mxu2  ;;  %v1776_v23 = vpop.f32.mrf.mxu3 }
 0x25b   :  { %v1728_v25 = vadd.f32 %v1727_v45, %v1679_v54  ;;  %v3745_v54 = vld [vmem:[#allocation15_spill] sm:$0xff] }
 0x25d   :  { %v3524_v36 = vadd.f32 %v1776_v23, %v1728_v25  ;;  %2073 = vmatpush.xpose.msrb.mxu0 %v2003_v37  ;;  %v3526_v34 = vpop.f32.mrf.mxu0  ;;  %v3528_v14 = vpop.f32.mrf.mxu1  ;;  %v3749_v37 = vld [vmem:[#allocation17_spill] sm:$0xff]  ;;  %v3750_v25 = vld [vmem:[#allocation18_spill] sm:$0xff] }
 0x260   :  { %1829 = vmatmul.bf16.gmra.mxu0 %v3734_v18  ;;  %1878 = vmatmul.bf16.gmra.mxu1 %v3735_v5  ;;  %v3751_v18 = vld [vmem:[#allocation21_spill] sm:$0xff] }
 0x261   :  { %2074 = vmatpush.xpose.msrb.mxu0 %v2000_v24  ;;  %v3570_v5 = vperm.slane %v3751_v18, 2 }
 0x262   :  { %v1729_v6 = vpop.f32.mrf.mxu2  ;;  %v1778_v44 = vpop.f32.mrf.mxu3 }
 0x263   :  { %v1730_v38 = vadd.f32 %v1729_v6, %v1681_v59 }
 0x265   :  { %v3534_v1 = vadd.f32 %v1778_v44, %v1730_v38  ;;  %2075 = vmatpush.xpose.msrb.mxu0 %v1997_v9  ;;  %v1636_v61 = vpop.f32.mrf.mxu0  ;;  %v1685_v19 = vpop.f32.mrf.mxu1 }
 0x266   :  { %v1637_v49 = vadd.f32 %v1636_v61, %v3463_v41 }
 0x267   :  { %1927 = vmatmul.bf16.gmra.mxu2 %v3737_v28  ;;  %1976 = vmatmul.bf16.gmra.mxu3 %v3738_v42 }
 0x268   :  { %v1686_v47 = vadd.f32 %v1685_v19, %v1637_v49 }
 0x26a   :  { %v3539_v20 = vpop.f32.mrf.mxu2  ;;  %v3541_v22 = vpop.f32.mrf.mxu3 }
 0x26d   :  { %v3543_v8 = vpop.f32.mrf.mxu0  ;;  %v3545_v4 = vpop.f32.mrf.mxu1 }
 0x270   :  { %1834 = vmatmul.bf16.gmra.mxu0 %v3739_v48  ;;  %1883 = vmatmul.bf16.gmra.mxu1 %v3740_v29 }
 0x272   :  { %v1734_v0 = vpop.f32.mrf.mxu2  ;;  %v1783_v2 = vpop.f32.mrf.mxu3 }
 0x273   :  { %v1735_v10 = vadd.f32 %v1734_v0, %v1686_v47 }
 0x275   :  { %v3549_v52 = vadd.f32 %v1783_v2, %v1735_v10  ;;  %v1641_v40 = vpop.f32.mrf.mxu0  ;;  %v3551_v51 = vpop.f32.mrf.mxu1 }
 0x277   :  { %1932 = vmatmul.bf16.gmra.mxu2 %v3741_v56  ;;  %1981 = vmatmul.bf16.gmra.mxu3 %v3742_v50 }
 0x27a   :  { %v3555_v27 = vpop.f32.mrf.mxu2  ;;  %v3557_v55 = vpop.f32.mrf.mxu3 }
 0x27d   :  { %v1644_v17 = vpop.f32.mrf.mxu0  ;;  %v1693_v12 = vpop.f32.mrf.mxu1 }
 0x27e   :  { %v1645_v0 = vadd.f32 %v1644_v17, %v3463_v41 }
 0x280   :  { %1839 = vmatmul.bf16.gmra.mxu0 %v3743_v16  ;;  %1888 = vmatmul.bf16.gmra.mxu1 %v3744_v13 }
 0x282   :  { %v1739_v32 = vpop.f32.mrf.mxu2  ;;  %v3561_v30 = vpop.f32.mrf.mxu3 }
 0x285   :  { %v1646_v7 = vpop.f32.mrf.mxu0  ;;  %v1695_v33 = vpop.f32.mrf.mxu1 }
 0x286   :  { %v1647_v19 = vadd.f32 %v1646_v7, %v3463_v41  ;;  %v1642_v7 = vadd.f32 %v1641_v40, %v3463_v41 }
 0x287   :  { %1937 = vmatmul.bf16.gmra.mxu2 %v3745_v54  ;;  %1986 = vmatmul.bf16.gmra.mxu3 %v3746_v57 }
 0x288   :  { %v1696_v2 = vadd.f32 %v1695_v33, %v1647_v19  ;;  %v1640_v33 = vadd.f32 %v3543_v8, %v3463_v41 }
 0x28a   :  { %v1742_v21 = vpop.f32.mrf.mxu2  ;;  %v1791_v60 = vpop.f32.mrf.mxu3 }
 0x28d   :  { %v1649_v63 = vpop.f32.mrf.mxu0  ;;  %v1698_v26 = vpop.f32.mrf.mxu1 }
 0x28e   :  { %v1650_v6 = vadd.f32 %v1649_v63, %v3463_v41 }
 0x290   :  { %1844 = vmatmul.bf16.gmra.mxu0 %v3747_v15  ;;  %1893 = vmatmul.bf16.gmra.mxu1 %v3748_v35  ;;  %v1699_v49 = vadd.f32 %v1698_v26, %v1650_v6  ;;  %v1694_v26 = vadd.f32 %v1693_v12, %v1645_v0 }
 0x292   :  { %v1744_v43 = vpop.f32.mrf.mxu2  ;;  %v1793_v59 = vpop.f32.mrf.mxu3 }
 0x293   :  { %v1745_v13 = vadd.f32 %v1744_v43, %v1696_v2 }
 0x295   :  { %v1651_v45 = vpop.f32.mrf.mxu0  ;;  %v1700_v23 = vpop.f32.mrf.mxu1 }
 0x296   :  { %v1652_v44 = vadd.f32 %v1651_v45, %v3463_v41  ;;  %v1743_v45 = vadd.f32 %v1742_v21, %v1694_v26  ;;  %v1689_v21 = vadd.f32 %v3545_v4, %v1640_v33  ;;  %v2019_v26 = vmax.f32 %v3534_v1, 0.0 }
 0x297   :  { %1942 = vmatmul.bf16.gmra.mxu2 %v3749_v37  ;;  %1991 = vmatmul.bf16.gmra.mxu3 %v3750_v25  ;;  %v1691_v25 = vadd.f32 %v3551_v51, %v1642_v7 }
 0x298   :  { %v1701_v28 = vadd.f32 %v1700_v23, %v1652_v44  ;;  %v1794_v23 = vadd.f32 %v1793_v59, %v1745_v13  ;;  %v1792_v18 = vadd.f32 %v1791_v60, %v1743_v45  ;;  %v1738_v8 = vadd.f32 %v3555_v27, %v1689_v21 }
 0x299   :  { %v1740_v12 = vadd.f32 %v1739_v32, %v1691_v25  ;;  %v2013_v25 = vmax.f32 %v3517_v53, 0.0  ;;  %v2007_v21 = vmax.f32 %v3503_v58, 0.0 }
 0x29a   :  { %v1747_v11 = vpop.f32.mrf.mxu2  ;;  %v1796_v24 = vpop.f32.mrf.mxu3  ;;  %v2037_v6 = vmax.f32 %v1794_v23, 0.0  ;;  %v1787_v4 = vadd.f32 %v3557_v55, %v1738_v8  ;;  %v2004_v8 = vmax.f32 %v3496_v3, 0.0 }
 0x29b   :  { %v1748_v48 = vadd.f32 %v1747_v11, %v1699_v49  ;;  %v1789_v51 = vadd.f32 %v3561_v30, %v1740_v12 }
 0x29d   :  { %v1810_v39 = vpop.f32.mrf.mxu0  ;;  %v1859_v9 = vpop.f32.mrf.mxu1  ;;  %v1797_v54 = vadd.f32 %v1796_v24, %v1748_v48 }
 0x29e   :  { %v1811_v38 = vadd.f32 %v1810_v39, %v3570_v5 }
 0x29f   :  { %v2040_v37 = vmax.f32 %v1797_v54, 0.0 }
 0x2a0   :  { %v1860_v61 = vadd.f32 %v1859_v9, %v1811_v38  ;;  %v2034_v9 = vmax.f32 %v1792_v18, 0.0 }
 0x2a2   :  { %v1749_v42 = vpop.f32.mrf.mxu2  ;;  %v1798_v47 = vpop.f32.mrf.mxu3 }
 0x2a3   :  { %v1750_v29 = vadd.f32 %v1749_v42, %v1701_v28  ;;  %v2031_v28 = vmax.f32 %v1789_v51, 0.0 }
 0x2a5   :  { %v1799_v10 = vadd.f32 %v1798_v47, %v1750_v29  ;;  %v1812_v56 = vpop.f32.mrf.mxu0  ;;  %v1861_v50 = vpop.f32.mrf.mxu1  ;;  %v2028_v29 = vmax.f32 %v1787_v4, 0.0  ;;  %v1998_v4 = vmax.f32 %v3481_v46, 0.0 }
 0x2a6   :  { %v1813_v16 = vadd.f32 %v1812_v56, %v3570_v5  ;;  %v2025_v56 = vmax.f32 %v3549_v52, 0.0  ;;  %v2016_v52 = vmax.f32 %v3524_v36, 0.0 }
 0x2a7   :  { %v2043_v57 = vmax.f32 %v1799_v10, 0.0 }
 0x2a8   :  { %v1862_v63 = vadd.f32 %v1861_v50, %v1813_v16 }
 0x2a9   :  { %2080 = vmatpush.xpose.msrb.mxu1 %v2043_v57 }
 0x2aa   :  { %v1908_v15 = vpop.f32.mrf.mxu2  ;;  %v1957_v35 = vpop.f32.mrf.mxu3 }
 0x2ab   :  { %v1909_v17 = vadd.f32 %v1908_v15, %v1860_v61  ;;  %v1635_v61 = vadd.f32 %v3526_v34, %v3463_v41 }
 0x2ad   :  { %v3582_v11 = vadd.f32 %v1957_v35, %v1909_v17  ;;  %2081 = vmatpush.xpose.msrb.mxu1 %v2040_v37  ;;  %v1815_v43 = vpop.f32.mrf.mxu0  ;;  %v1864_v24 = vpop.f32.mrf.mxu1  ;;  %v1684_v27 = vadd.f32 %v3528_v14, %v1635_v61 }
 0x2ae   :  { %v1816_v40 = vadd.f32 %v1815_v43, %v3570_v5 }
 0x2af   :  { %v1733_v48 = vadd.f32 %v3539_v20, %v1684_v27 }
 0x2b0   :  { %v1865_v44 = vadd.f32 %v1864_v24, %v1816_v40  ;;  %v2010_v40 = vmax.f32 %v3510_v62, 0.0 }
 0x2b1   :  { %2082 = vmatpush.xpose.msrb.mxu1 %v2037_v6  ;;  %v1782_v55 = vadd.f32 %v3541_v22, %v1733_v48 }
 0x2b2   :  { %v1910_v59 = vpop.f32.mrf.mxu2  ;;  %v1959_v39 = vpop.f32.mrf.mxu3 }
 0x2b3   :  { %v1911_v38 = vadd.f32 %v1910_v59, %v1862_v63  ;;  %v2022_v13 = vmax.f32 %v1782_v55, 0.0 }
 0x2b5   :  { %v3590_v19 = vadd.f32 %v1959_v39, %v1911_v38  ;;  %2083 = vmatpush.xpose.msrb.mxu1 %v2034_v9  ;;  %v1817_v32 = vpop.f32.mrf.mxu0  ;;  %v1866_v60 = vpop.f32.mrf.mxu1 }
 0x2b6   :  { %v1818_v49 = vadd.f32 %v1817_v32, %v3570_v5  ;;  %v2001_v32 = vmax.f32 %v3490_v31, 0.0 }
 0x2b8   :  { %v1867_v42 = vadd.f32 %v1866_v60, %v1818_v49 }
 0x2b9   :  { %2084 = vmatpush.xpose.msrb.mxu1 %v2031_v28 }
 0x2ba   :  { %v1913_v30 = vpop.f32.mrf.mxu2  ;;  %v1962_v47 = vpop.f32.mrf.mxu3 }
 0x2bb   :  { %v1914_v41 = vadd.f32 %v1913_v30, %v1865_v44 }
 0x2bd   :  { %v3596_v34 = vadd.f32 %v1962_v47, %v1914_v41  ;;  %2085 = vmatpush.xpose.msrb.mxu1 %v2028_v29  ;;  %v1820_v0 = vpop.f32.mrf.mxu0  ;;  %v1869_v2 = vpop.f32.mrf.mxu1 }
 0x2be   :  { %v1821_v10 = vadd.f32 %v1820_v0, %v3570_v5 }
 0x2c0   :  { %v1870_v50 = vadd.f32 %v1869_v2, %v1821_v10 }
 0x2c1   :  { %2086 = vmatpush.xpose.msrb.mxu1 %v2025_v56 }
 0x2c2   :  { %v1915_v14 = vpop.f32.mrf.mxu2  ;;  %v1964_v16 = vpop.f32.mrf.mxu3 }
 0x2c3   :  { %v1916_v54 = vadd.f32 %v1915_v14, %v1867_v42 }
 0x2c5   :  { %v3601_v20 = vadd.f32 %v1964_v16, %v1916_v54  ;;  %2087 = vmatpush.xpose.msrb.mxu1 %v2022_v13  ;;  %v1822_v57 = vpop.f32.mrf.mxu0  ;;  %v1871_v63 = vpop.f32.mrf.mxu1 }
 0x2c6   :  { %v1823_v7 = vadd.f32 %v1822_v57, %v3570_v5 }
 0x2c8   :  { %v1872_v15 = vadd.f32 %v1871_v63, %v1823_v7 }
 0x2c9   :  { %2088 = vmatpush.xpose.msrb.mxu1 %v2019_v26 }
 0x2ca   :  { %v1918_v22 = vpop.f32.mrf.mxu2  ;;  %v1967_v35 = vpop.f32.mrf.mxu3 }
 0x2cb   :  { %v1919_v45 = vadd.f32 %v1918_v22, %v1870_v50 }
 0x2cd   :  { %v3606_v23 = vadd.f32 %v1967_v35, %v1919_v45  ;;  %2089 = vmatpush.xpose.msrb.mxu1 %v2016_v52  ;;  %v1825_v37 = vpop.f32.mrf.mxu0  ;;  %v1874_v17 = vpop.f32.mrf.mxu1 }
 0x2ce   :  { %v1826_v33 = vadd.f32 %v1825_v37, %v3570_v5 }
 0x2d0   :  { %v1875_v43 = vadd.f32 %v1874_v17, %v1826_v33 }
 0x2d1   :  { %2090 = vmatpush.xpose.msrb.mxu1 %v2013_v25 }
 0x2d2   :  { %v1920_v24 = vpop.f32.mrf.mxu2  ;;  %v1969_v1 = vpop.f32.mrf.mxu3 }
 0x2d3   :  { %v1921_v12 = vadd.f32 %v1920_v24, %v1872_v15 }
 0x2d5   :  { %v3611_v18 = vadd.f32 %v1969_v1, %v1921_v12  ;;  %2091 = vmatpush.xpose.msrb.mxu1 %v2010_v40  ;;  %v1827_v36 = vpop.f32.mrf.mxu0  ;;  %v1876_v6 = vpop.f32.mrf.mxu1 }
 0x2d6   :  { %v1828_v44 = vadd.f32 %v1827_v36, %v3570_v5 }
 0x2d8   :  { %v1877_v59 = vadd.f32 %v1876_v6, %v1828_v44 }
 0x2d9   :  { %2092 = vmatpush.xpose.msrb.mxu1 %v2007_v21 }
 0x2da   :  { %v1923_v39 = vpop.f32.mrf.mxu2  ;;  %v1972_v53 = vpop.f32.mrf.mxu3 }
 0x2db   :  { %v1924_v51 = vadd.f32 %v1923_v39, %v1875_v43 }
 0x2dd   :  { %v3616_v9 = vadd.f32 %v1972_v53, %v1924_v51  ;;  %2093 = vmatpush.xpose.msrb.mxu1 %v2004_v8  ;;  %v1830_v62 = vpop.f32.mrf.mxu0  ;;  %v1879_v38 = vpop.f32.mrf.mxu1 }
 0x2de   :  { %v1831_v61 = vadd.f32 %v1830_v62, %v3570_v5 }
 0x2e0   :  { %v1880_v60 = vadd.f32 %v1879_v38, %v1831_v61 }
 0x2e1   :  { %2094 = vmatpush.xpose.msrb.mxu1 %v2001_v32 }
 0x2e2   :  { %v1925_v49 = vpop.f32.mrf.mxu2  ;;  %v1974_v58 = vpop.f32.mrf.mxu3 }
 0x2e3   :  { %v1926_v28 = vadd.f32 %v1925_v49, %v1877_v59 }
 0x2e5   :  { %v3621_v42 = vadd.f32 %v1974_v58, %v1926_v28  ;;  %2095 = vmatpush.xpose.msrb.mxu1 %v1998_v4  ;;  %v1832_v3 = vpop.f32.mrf.mxu0  ;;  %v1881_v27 = vpop.f32.mrf.mxu1 }
 0x2e6   :  { %v1833_v30 = vadd.f32 %v1832_v3, %v3570_v5 }
 0x2e8   :  { %v1882_v47 = vadd.f32 %v1881_v27, %v1833_v30 }
 0x2ea   :  { %v1928_v48 = vpop.f32.mrf.mxu2  ;;  %v1977_v29 = vpop.f32.mrf.mxu3 }
 0x2eb   :  { %v1929_v41 = vadd.f32 %v1928_v48, %v1880_v60 }
 0x2ed   :  { %v3624_v0 = vadd.f32 %v1977_v29, %v1929_v41  ;;  %v1835_v31 = vpop.f32.mrf.mxu0  ;;  %v1884_v2 = vpop.f32.mrf.mxu1 }
 0x2ee   :  { %v1836_v28 = vadd.f32 %v1835_v31, %v3570_v5  ;;  %v2020_v31 = vmax.f32 %v3621_v42, 0.0  ;;  %v2011_v42 = vmax.f32 %v3606_v23, 0.0 }
 0x2f0   :  { %v1885_v48 = vadd.f32 %v1884_v2, %v1836_v28  ;;  %v2045_v2 = vld [vmem:[%s3654_s7] sm:$0x7]  ;;  %s2764_s7 = smov [#allocation6]  }
 0x2f1   :  { %s2126_s26 = sshll.u32 %s2764_s7, 4  ;;  %s2127_s26 = int_to_ptr.vmem [resolvable:$true] %s2126_s26 }
 0x2f2   :  { %v1930_v10 = vpop.f32.mrf.mxu2  ;;  %v1979_v55 = vpop.f32.mrf.mxu3 }
 0x2f3   :  { %v1931_v56 = vadd.f32 %v1930_v10, %v1882_v47 }
 0x2f5   :  { %v1980_v46 = vadd.f32 %v1979_v55, %v1931_v56  ;;  %v1837_v50 = vpop.f32.mrf.mxu0  ;;  %v1886_v14 = vpop.f32.mrf.mxu1 }
 0x2f6   :  { %v1838_v32 = vadd.f32 %v1837_v50, %v3570_v5 }
 0x2f8   :  { %v1887_v3 = vadd.f32 %v1886_v14, %v1838_v32  ;;  %v2054_v14 = vperm.slane %v2045_v2, 0 }
 0x2fa   :  { %v1933_v16 = vpop.f32.mrf.mxu2  ;;  %v1982_v13 = vpop.f32.mrf.mxu3  ;;  %2076 = vmatmul.f32.vlgmr.msrb.gmra.mxu0 %v2054_v14 }
 0x2fb   :  { %v1934_v29 = vadd.f32 %v1933_v16, %v1885_v48  ;;  %v2055_v16 = vperm.slane %v2045_v2, 1 }
 0x2fd   :  { %v1840_v54 = vpop.f32.mrf.mxu0  ;;  %v1889_v57 = vpop.f32.mrf.mxu1  ;;  %v1983_v55 = vadd.f32 %v1982_v13, %v1934_v29  ;;  %v2763_v13 = vmov 0   ;;  %2096 = vmatmul.f32.vlgmr.msrb.gmra.mxu1 %v2055_v16 }
 0x2fe   :  { %v1841_v53 = vadd.f32 %v1840_v54, %v3570_v5  ;;  %v2026_v54 = vmax.f32 %v1980_v46, 0.0  ;;  %2707 = vset.pattern.permute.xlu0 %v2763_v13  ;;  %v2017_v46 = vmax.f32 %v3616_v9, 0.0  ;;  %v2056_v9 = vperm.slane %v2045_v2, 2 }
 0x2ff   :  { %v2029_v50 = vmax.f32 %v1983_v55, 0.0 }
 0x300   :  { %v1890_v60 = vadd.f32 %v1889_v57, %v1841_v53  ;;  %v2046_v57 = vld [vmem:[#allocation2] sm:$0x1] }
 0x301   :  { %2049 = vperm.xlu0 %2707, %v2046_v57  }
 0x302   :  { %v1935_v63 = vpop.f32.mrf.mxu2  ;;  %v1984_v7 = vpop.f32.mrf.mxu3 }
 0x303   :  { %v1936_v27 = vadd.f32 %v1935_v63, %v1887_v3  ;;  %v2008_v63 = vmax.f32 %v3601_v20, 0.0 }
 0x305   :  { %v1842_v26 = vpop.f32.mrf.mxu0  ;;  %v1891_v35 = vpop.f32.mrf.mxu1  ;;  %v1985_v41 = vadd.f32 %v1984_v7, %v1936_v27  ;;  %v2005_v7 = vmax.f32 %v3596_v34, 0.0 }
 0x306   :  { %v1843_v12 = vadd.f32 %v1842_v26, %v3570_v5  ;;  %v2002_v26 = vmax.f32 %v3590_v19, 0.0 }
 0x307   :  { %v2032_v56 = vmax.f32 %v1985_v41, 0.0 }
 0x308   :  { %v1892_v8 = vadd.f32 %v1891_v35, %v1843_v12 }
 0x30a   :  { %v1938_v15 = vpop.f32.mrf.mxu2  ;;  %v1987_v22 = vpop.f32.mrf.mxu3 }
 0x30b   :  { %v1939_v49 = vadd.f32 %v1938_v15, %v1890_v60  ;;  %v1999_v15 = vmax.f32 %v3582_v11, 0.0 }
 0x30d   :  { %v1845_v52 = vpop.f32.mrf.mxu0  ;;  %v1894_v17 = vpop.f32.mrf.mxu1  ;;  %v1988_v30 = vadd.f32 %v1987_v22, %v1939_v49 }
 0x30e   :  { %v1846_v24 = vadd.f32 %v1845_v52, %v3570_v5 }
 0x30f   :  { %v2035_v10 = vmax.f32 %v1988_v30, 0.0 }
 0x310   :  { %v1895_v36 = vadd.f32 %v1894_v17, %v1846_v24 }
 0x312   :  { %v1940_v45 = vpop.f32.mrf.mxu2  ;;  %v1989_v37 = vpop.f32.mrf.mxu3 }
 0x313   :  { %v1941_v62 = vadd.f32 %v1940_v45, %v1892_v8 }
 0x315   :  { %v1847_v33 = vpop.f32.mrf.mxu0  ;;  %v1896_v40 = vpop.f32.mrf.mxu1  ;;  %v1990_v58 = vadd.f32 %v1989_v37, %v1941_v62 }
 0x316   :  { %v1848_v1 = vadd.f32 %v1847_v33, %v3570_v5  ;;  %v2023_v5 = vmax.f32 %v3624_v0, 0.0  ;;  %v2014_v0 = vmax.f32 %v3611_v18, 0.0 }
 0x317   :  { %v2038_v47 = vmax.f32 %v1990_v58, 0.0 }
 0x318   :  { %v1897_v6 = vadd.f32 %v1896_v40, %v1848_v1 }
 0x31a   :  { %v1943_v25 = vpop.f32.mrf.mxu2  ;;  %v1992_v43 = vpop.f32.mrf.mxu3 }
 0x31b   :  { %v1944_v21 = vadd.f32 %v1943_v25, %v1895_v36 }
 0x31d   :  { %v1993_v38 = vadd.f32 %v1992_v43, %v1944_v21 }
 0x31f   :  { %v2041_v4 = vmax.f32 %v1993_v38, 0.0 }
 0x322   :  { %v1945_v44 = vpop.f32.mrf.mxu2  ;;  %v1994_v39 = vpop.f32.mrf.mxu3 }
 0x323   :  { %v1946_v59 = vadd.f32 %v1945_v44, %v1897_v6 }
 0x325   :  { %v1995_v51 = vadd.f32 %v1994_v39, %v1946_v59 }
 0x327   :  { %v2044_v61 = vmax.f32 %v1995_v51, 0.0 }
 0x329   :  { %2100 = vmatpush.xpose.msrb.mxu2 %v2044_v61 }
 0x32d   :  { %2101 = vmatpush.xpose.msrb.mxu2 %v2041_v4 }
 0x331   :  { %2102 = vmatpush.xpose.msrb.mxu2 %v2038_v47 }
 0x335   :  { %2103 = vmatpush.xpose.msrb.mxu2 %v2035_v10 }
 0x339   :  { %2104 = vmatpush.xpose.msrb.mxu2 %v2032_v56 }
 0x33d   :  { %2105 = vmatpush.xpose.msrb.mxu2 %v2029_v50 }
 0x341   :  { %2106 = vmatpush.xpose.msrb.mxu2 %v2026_v54 }
 0x345   :  { %2107 = vmatpush.xpose.msrb.mxu2 %v2023_v5 }
 0x349   :  { %2108 = vmatpush.xpose.msrb.mxu2 %v2020_v31 }
 0x34d   :  { %2109 = vmatpush.xpose.msrb.mxu2 %v2017_v46 }
 0x351   :  { %2110 = vmatpush.xpose.msrb.mxu2 %v2014_v0 }
 0x355   :  { %2111 = vmatpush.xpose.msrb.mxu2 %v2011_v42 }
 0x359   :  { %2112 = vmatpush.xpose.msrb.mxu2 %v2008_v63 }
 0x35d   :  { %2113 = vmatpush.xpose.msrb.mxu2 %v2005_v7 }
 0x361   :  { %2114 = vmatpush.xpose.msrb.mxu2 %v2002_v26 }
 0x365   :  { %2115 = vmatpush.xpose.msrb.mxu2 %v1999_v15 }
 0x368   :  { %2116 = vmatmul.f32.vlgmr.msrb.gmra.mxu2 %v2056_v9 }
 0x373   :  { %v2050_v22 = vpop.permute.xlu0 %2049 }
 0x374   :  { %v2052_v18 = vperm.slane %v2050_v22, 0 }
 0x377   :  { %v2077_v35 = vpop.f32.mrf.mxu0 }
 0x378   :  { %v2078_v52 = vadd.f32 %v2077_v35, %v2052_v18 }
 0x37a   :  { %v2097_v23 = vpop.f32.mrf.mxu1 }
 0x37b   :  { %v2098_v45 = vadd.f32 %v2097_v23, %v2078_v52 }
 0x3eb   :  { %v2117_v34 = vpop.f32.mrf.mxu2 }
 0x3ec   :  { %v2118_v19 = vadd.f32 %v2117_v34, %v2098_v45 }
 0x3ee   :  { %2120 = vst [vmem:[#allocation6] sm:$0x1] %v2118_v19 }
 0x3ef   :  { %2131 = dma.vmem_to_hbm [thread:$0]  %s2127_s26, 16, %s2129_s28, [#allocation5]  }
 0x3f0   :  { %2758 = dma.done.wait [#allocation5], 16  }
 0x3f1   :  { %2759 = vsyncadd [#allocation5], 4294967280 }
 0x3f2   :  { %2136 = vsyncpa [#allocation4], 1 }
 0x3f3   :  { %2137 = vsyncpa [#allocation5], 1 }

</bundles_post_ra>
